<compile_context>
chip_gen: v7x
topology: tpu7x:2x2x1
jax: 0.10.0
libtpu: 0.0.40
codegen_flags: <defaults>
</compile_context>

<pallas_src>
import functools
import math

import jax
import jax.numpy as jnp
from jax import lax
from jax.experimental import pallas as pl
from jax.experimental.pallas import tpu as pltpu

NEG_SLOPE = 0.01          # nn.LeakyReLU default negative_slope
L2_EPS = 1e-12            # F.normalize default eps
LANE = 128
SUBLANE = 8
ROW_TILE_TARGET = 256     # >=512-row tiles for big inputs would also be fine
VMEM_LIMIT = 48 * 1024 * 1024   # headroom under v7x's 64 MiB physical VMEM


# ---------------------------------------------------------------------------
# Small helpers
# ---------------------------------------------------------------------------
def _round_up(n, m):
    return ((n + m - 1) // m) * m


def _row_tile(n):
    return min(ROW_TILE_TARGET, _round_up(max(n, 1), SUBLANE))


def _pad2d(x, rows, cols, dtype=jnp.bfloat16):
    r, c = x.shape
    return jnp.pad(x, ((0, rows - r), (0, cols - c))).astype(dtype)


def _mm(a, b):
    # (N, K) @ (K, M) on the MXU, f32 accumulation.
    return lax.dot_general(a, b, (((1,), (0,)), ((), ())),
                           preferred_element_type=jnp.float32)


def _mm_tt(a, b):
    # a^T @ b: contract dim 0 of both operands (transpose folded, not
    # materialized).
    return lax.dot_general(a, b, (((0,), (0,)), ((), ())),
                           preferred_element_type=jnp.float32)


def _finish(terms, w_ref, b_ref, out_ref):
    """out = L2norm(LeakyReLU(sum_k terms[k] @ W[k] + b)), f32 accumulation."""
    acc = None
    for k, t in enumerate(terms):
        p = _mm(t.astype(jnp.bfloat16), w_ref[k])
        acc = p if acc is None else acc + p
    z = acc + b_ref[...]
    z = jnp.where(z >= 0, z, NEG_SLOPE * z)
    # TODO(synk): nn.Dropout omitted -- eval-mode (identity) semantics.
    sumsq = jnp.sum(z * z, axis=1, keepdims=True)
    inv = lax.rsqrt(jnp.maximum(sumsq, L2_EPS * L2_EPS))   # == 1/max(||z||, eps)
    out_ref[...] = (z * inv).astype(out_ref.dtype)


# ---------------------------------------------------------------------------
# Kernels
# ---------------------------------------------------------------------------
def _attention_kernel(item_ref, mem_ref, out_ref, *, i_valid):
    """attentive_item = (sum_g softmax_items(item @ mem_g^T) @ mem_g) * item,
    done as two 2-D MXU matmuls over the flattened [G*M, F] member slab."""
    item = item_ref[...]                         # [Ip, Fp]  bf16
    mem = mem_ref[...]                           # [GMp, Fp] bf16 (zero-padded)
    e = lax.dot_general(item, mem, (((1,), (1,)), ((), ())),
                        preferred_element_type=jnp.float32)      # [Ip, GMp]
    if i_valid < e.shape[0]:
        # Padded item rows must not enter the item-axis softmax denominator.
        row = lax.broadcasted_iota(jnp.int32, e.shape, 0)
        e = jnp.where(row < i_valid, e, -1e30)
    e = e - jnp.max(e, axis=0, keepdims=True)    # softmax over ITEM axis
    p = jnp.exp(e)
    w = p * pl.reciprocal(jnp.sum(p, axis=0, keepdims=True), approx=True)
    all_att = _mm(w.astype(jnp.bfloat16), mem)                   # [Ip, Fp] f32
    out_ref[...] = (all_att * item).astype(out_ref.dtype)        # attentive_item


def _ui_update_kernel(x_ref, adj_a_ref, peer_a_ref, adj_d_ref, peer_d_ref,
                      w_ref, b_ref, out_ref, *, a_t, d_t):
    """User / item update: terms = [x, a, a*x, d*x, d] with a/d = adjacency
    propagations (transposes folded via contraction dims when *_t=True)."""
    x = x_ref[...]
    a = (_mm_tt if a_t else _mm)(adj_a_ref[...], peer_a_ref[...])
    d = (_mm_tt if d_t else _mm)(adj_d_ref[...], peer_d_ref[...])
    _finish([x, a, a * x, d * x, d], w_ref, b_ref, out_ref)


def _group_update_kernel(g_ref, rgi_ref, item_ref, rgu_ref, user_ref,
                         att_item_ref, w_ref, b_ref, out_ref):
    """Group update: terms = [g, rgi@item, (rgu@user)*g, (rgi@item)*g,
    rgi@attentive_item]."""
    g = g_ref[...]
    a = _mm(rgi_ref[...], item_ref[...])
    e2 = _mm(rgu_ref[...], user_ref[...])
    att = _mm(rgi_ref[...], att_item_ref[...])
    _finish([g, a, e2 * g, a * g, att], w_ref, b_ref, out_ref)


# ---------------------------------------------------------------------------
# Forward wrapper
# ---------------------------------------------------------------------------
def gnn_layer_forward(packed, group_emb, user_emb, item_emb, member_idx,
                      rgi, rgu, rui, *, f_out):
    g_n, f_in = group_emb.shape
    u_n = user_emb.shape[0]
    i_n = item_emb.shape[0]
    gm_n = member_idx.shape[0] * member_idx.shape[1]

    f_p = _round_up(f_in, LANE)
    fo_p = _round_up(f_out, LANE)
    t_g, t_u, t_i = _row_tile(g_n), _row_tile(u_n), _row_tile(i_n)
    g_p, u_p, i_p = _round_up(g_n, t_g), _round_up(u_n, t_u), _round_up(i_n, t_i)
    gm_p = _round_up(gm_n, LANE)

    # Zero-pad to lane/sublane-friendly shapes; cast MXU operands to bf16.
    group_b = _pad2d(group_emb, g_p, f_p)
    user_b = _pad2d(user_emb, u_p, f_p)
    item_b = _pad2d(item_emb, i_p, f_p)
    rgi_b = _pad2d(rgi, g_p, i_p)
    rgu_b = _pad2d(rgu, g_p, u_p)
    rui_b = _pad2d(rui, u_p, i_p)

    # Member slab gather: one fused XLA gather into a [G*M, Fp] slab.
    # TODO(synk): ragged per-group member lists need padding + softmax masking.
    # TODO(synk): an in-kernel gather (member_idx in SMEM) would drop the
    #             duplicated slab's HBM traffic; kept in XLA for lowering safety.
    mem = user_b[member_idx.reshape(-1)]
    mem_b = jnp.pad(mem, ((0, gm_p - gm_n), (0, 0)))

    cp_seq = pltpu.CompilerParams(vmem_limit_bytes=VMEM_LIMIT)
    cp_par = pltpu.CompilerParams(dimension_semantics=("parallel",),
                                  vmem_limit_bytes=VMEM_LIMIT)

    # ---- batched member attention: two 2-D MXU matmuls ----------------------
    attentive_item = pl.pallas_call(
        functools.partial(_attention_kernel, i_valid=i_n),
        out_shape=jax.ShapeDtypeStruct((i_p, f_p), jnp.bfloat16),
        compiler_params=cp_seq,
    )(item_b, mem_b)

    def full(shape):
        return pl.BlockSpec(shape, lambda i: (0,) * len(shape))

    w_spec = full((5, f_p, fo_p))
    b_spec = full((1, fo_p))

    # ---- user update ---------------------------------------------------------
    user_out = pl.pallas_call(
        functools.partial(_ui_update_kernel, a_t=False, d_t=True),
        grid=(u_p // t_u,),
        in_specs=[
            pl.BlockSpec((t_u, f_p), lambda i: (i, 0)),     # user row tile
            pl.BlockSpec((t_u, i_p), lambda i: (i, 0)),     # rui row tile
            full((i_p, f_p)),                               # item (all)
            pl.BlockSpec((g_p, t_u), lambda i: (0, i)),     # rgu column tile
            full((g_p, f_p)),                               # group (all)
            w_spec, b_spec,
        ],
        out_specs=pl.BlockSpec((t_u, fo_p), lambda i: (i, 0)),
        out_shape=jax.ShapeDtypeStruct((u_p, fo_p), jnp.float32),
        compiler_params=cp_par,
    )(user_b, rui_b, item_b, rgu_b, group_b, packed["u_w"], packed["u_b"])

    # ---- item update ---------------------------------------------------------
    item_out = pl.pallas_call(
        functools.partial(_ui_update_kernel, a_t=True, d_t=True),
        grid=(i_p // t_i,),
        in_specs=[
            pl.BlockSpec((t_i, f_p), lambda i: (i, 0)),     # item row tile
            pl.BlockSpec((u_p, t_i), lambda i: (0, i)),     # rui column tile
            full((u_p, f_p)),                               # user (all)
            pl.BlockSpec((g_p, t_i), lambda i: (0, i)),     # rgi column tile
            full((g_p, f_p)),                               # group (all)
            w_spec, b_spec,
        ],
        out_specs=pl.BlockSpec((t_i, fo_p), lambda i: (i, 0)),
        out_shape=jax.ShapeDtypeStruct((i_p, fo_p), jnp.float32),
        compiler_params=cp_par,
    )(item_b, rui_b, user_b, rgi_b, group_b, packed["i_w"], packed["i_b"])

    # ---- group update --------------------------------------------------------
    group_out = pl.pallas_call(
        _group_update_kernel,
        grid=(g_p // t_g,),
        in_specs=[
            pl.BlockSpec((t_g, f_p), lambda i: (i, 0)),     # group row tile
            pl.BlockSpec((t_g, i_p), lambda i: (i, 0)),     # rgi row tile
            full((i_p, f_p)),                               # item (all)
            pl.BlockSpec((t_g, u_p), lambda i: (i, 0)),     # rgu row tile
            full((u_p, f_p)),                               # user (all)
            full((i_p, f_p)),                               # attentive_item
            w_spec, b_spec,
        ],
        out_specs=pl.BlockSpec((t_g, fo_p), lambda i: (i, 0)),
        out_shape=jax.ShapeDtypeStruct((g_p, fo_p), jnp.float32),
        compiler_params=cp_par,
    )(group_b, rgi_b, item_b, rgu_b, user_b, attentive_item,
      packed["g_w"], packed["g_b"])

    return (group_out[:g_n, :f_out],
            user_out[:u_n, :f_out],
            item_out[:i_n, :f_out])


# ---------------------------------------------------------------------------
# Parameter init (nn.Linear default scheme, torch layout) + one-time packing.
# ---------------------------------------------------------------------------
def init_params(key, in_f, out_f):
    bound = 1.0 / math.sqrt(in_f)
    params = {}
    for prefix in ("u", "i", "g"):
        ws, bs = [], []
        for _ in range(5):
            key, kw, kb = jax.random.split(key, 3)
            ws.append(jax.random.uniform(kw, (out_f, in_f), jnp.float32, -bound, bound))
            bs.append(jax.random.uniform(kb, (out_f,), jnp.float32, -bound, bound))
        params[prefix] = (ws, bs)
    return params, key


def pack_params(params, in_f, out_f):
    """Pre-transpose + zero-pad to [5, Fp, Fop] bf16 weight stacks; sum biases
    once (padded columns stay exactly 0 -> don't perturb the row L2 norm)."""
    f_p = _round_up(in_f, LANE)
    fo_p = _round_up(out_f, LANE)
    packed = {}
    for prefix, (ws, bs) in params.items():
        packed[f"{prefix}_w"] = jnp.stack(
            [_pad2d(w.T, f_p, fo_p, jnp.bfloat16) for w in ws])
        packed[f"{prefix}_b"] = jnp.zeros((1, fo_p), jnp.float32).at[0, :out_f].set(sum(bs))
    return packed


# ---------------------------------------------------------------------------
# Pure-JAX f32 reference of the PyTorch forward (correctness self-check).
# ---------------------------------------------------------------------------
def _reference_forward(params, group_emb, user_emb, item_emb, member_idx, rgi, rgu, rui):
    hp = lax.Precision.HIGHEST
    dot = lambda a, b: jnp.dot(a, b, precision=hp)

    def update(terms, ws, bs):
        z = sum(dot(t, w.T) + b for t, w, b in zip(terms, ws, bs))
        z = jnp.where(z >= 0, z, NEG_SLOPE * z)
        n = jnp.sqrt(jnp.sum(z * z, axis=1, keepdims=True))
        return z / jnp.maximum(n, L2_EPS)

    embed_rui_ei = dot(rui, item_emb)
    embed_rgu_t_eg = dot(rgu.T, group_emb)
    user_out = update([user_emb, embed_rui_ei, embed_rui_ei * user_emb,
                       embed_rgu_t_eg * user_emb, embed_rgu_t_eg], *params["u"])

    all_att = jnp.zeros_like(item_emb)
    for g in range(member_idx.shape[0]):
        mem = user_emb[member_idx[g]]
        e = dot(item_emb, mem.T)
        w = jax.nn.softmax(e, axis=0)
        all_att = all_att + dot(w, mem)
    attentive_item = all_att * item_emb

    embed_rgi_t_eg = dot(rgi.T, group_emb)
    embed_rui_t_eu = dot(rui.T, user_emb)
    item_out = update([item_emb, embed_rui_t_eu, embed_rui_t_eu * item_emb,
                       embed_rgi_t_eg * item_emb, embed_rgi_t_eg], *params["i"])

    embed_rgi_ei = dot(rgi, item_emb)
    embed_rgu_eu = dot(rgu, user_emb)
    embed_atten = dot(rgi, attentive_item)
    group_out = update([group_emb, embed_rgi_ei, embed_rgu_eu * group_emb,
                        embed_rgi_ei * group_emb, embed_atten], *params["g"])
    return group_out, user_out, item_out


if __name__ == "__main__":
    inF = outF = 32
    G, U, I, M = 8, 16, 16, 8

    key = jax.random.PRNGKey(0)
    params, key = init_params(key, inF, outF)
    packed = pack_params(params, inF, outF)

    key, kg, ku, ki, kgi, kgu, kui = jax.random.split(key, 7)
    group_emb = jax.random.normal(kg, (G, inF), jnp.float32)
    user_emb = jax.random.normal(ku, (U, inF), jnp.float32)
    item_emb = jax.random.normal(ki, (I, inF), jnp.float32)

    # Dense stand-ins for the (row-normalized) sparse adjacency matrices.
    rgi = (jax.random.uniform(kgi, (G, I)) < 0.4).astype(jnp.float32)
    rgu = (jax.random.uniform(kgu, (G, U)) < 0.4).astype(jnp.float32)
    rui = (jax.random.uniform(kui, (U, I)) < 0.4).astype(jnp.float32)
    rgi = rgi / jnp.maximum(rgi.sum(axis=1, keepdims=True), 1.0)
    rgu = rgu / jnp.maximum(rgu.sum(axis=1, keepdims=True), 1.0)
    rui = rui / jnp.maximum(rui.sum(axis=1, keepdims=True), 1.0)

    # group -> member-user-index dict (equal member counts) as dense [G, M].
    gu_dict = {g: [(2 * g + m) % U for m in range(M)] for g in range(G)}
    member_idx = jnp.asarray([gu_dict[g] for g in sorted(gu_dict)], dtype=jnp.int32)

    fwd = jax.jit(gnn_layer_forward, static_argnames=("f_out",))
    group_norm, user_norm, item_norm = fwd(packed, group_emb, user_emb, item_emb,
                                           member_idx, rgi, rgu, rui, f_out=outF)
    jax.block_until_ready((group_norm, user_norm, item_norm))

    assert group_norm.shape == (G, outF)
    assert user_norm.shape == (U, outF)
    assert item_norm.shape == (I, outF)

    ref_g, ref_u, ref_i = _reference_forward(params, group_emb, user_emb, item_emb,
                                             member_idx, rgi, rgu, rui)
    max_diff = max(float(jnp.max(jnp.abs(group_norm - ref_g))),
                   float(jnp.max(jnp.abs(user_norm - ref_u))),
                   float(jnp.max(jnp.abs(item_norm - ref_i))))
    # Tolerance covers bf16 MXU operands + approx reciprocal; f32 accumulation
    # and the final row L2-normalization keep it well inside this bound.
    assert max_diff < 7.5e-2, f"kernel vs reference mismatch: {max_diff}"

    print("KERNEL_OK")
</pallas_src>

<mosaic_0001>
module attributes {stable_mosaic.version = 11 : i64} {
  func.func @_attention_kernel(%arg0: memref<16x128xbf16, #tpu.memory_space<vmem>>, %arg1: memref<128x128xbf16, #tpu.memory_space<vmem>>, %arg2: memref<16x128xbf16, #tpu.memory_space<vmem>>) attributes {dimension_semantics = [], scalar_prefetch = 0 : i64, scratch_operands = 0 : i64, tpu.core_type = #tpu.core_type<tc>} {
    %c0 = arith.constant 0 : index
    %c0_0 = arith.constant 0 : index
    %0 = vector.load %arg0[%c0, %c0_0] : memref<16x128xbf16, #tpu.memory_space<vmem>>, vector<16x128xbf16>
    %c0_1 = arith.constant 0 : index
    %c0_2 = arith.constant 0 : index
    %1 = vector.load %arg1[%c0_1, %c0_2] : memref<128x128xbf16, #tpu.memory_space<vmem>>, vector<128x128xbf16>
    %cst = arith.constant dense<0.000000e+00> : vector<16x128xf32>
    %2 = tpu.matmul %0, %1, %cst {dimension_numbers = #tpu.dot_dimension_numbers<[1], [1], [0], [0], [0, 0, 1, 0], [], []>} : vector<16x128xbf16>, vector<128x128xbf16>, vector<16x128xf32> -> vector<16x128xf32>
    %cst_3 = arith.constant dense<0xFF800000> : vector<128xf32>
    %3 = vector.multi_reduction <maximumf>, %2, %cst_3 [0] : vector<16x128xf32> to vector<128xf32>
    %4 = vector.shape_cast %3 : vector<128xf32> to vector<1x128xf32>
    %5 = vector.broadcast %4 : vector<1x128xf32> to vector<16x128xf32>
    %6 = arith.subf %2, %5 : vector<16x128xf32>
    %7 = math.exp %6 : vector<16x128xf32>
    %cst_4 = arith.constant dense<0.000000e+00> : vector<128xf32>
    %8 = vector.multi_reduction <add>, %7, %cst_4 [0] : vector<16x128xf32> to vector<128xf32>
    %9 = vector.shape_cast %8 : vector<128xf32> to vector<1x128xf32>
    %10 = tpu.reciprocal %9 {approx = true} : vector<1x128xf32> -> vector<1x128xf32>
    %11 = vector.broadcast %10 : vector<1x128xf32> to vector<16x128xf32>
    %12 = arith.mulf %7, %11 : vector<16x128xf32>
    %13 = arith.truncf %12 : vector<16x128xf32> to vector<16x128xbf16>
    %cst_5 = arith.constant dense<0.000000e+00> : vector<16x128xf32>
    %14 = tpu.matmul %13, %1, %cst_5 {dimension_numbers = #tpu.dot_dimension_numbers<[1], [0], [0], [1], [0, 0, 1, 1], [], []>} : vector<16x128xbf16>, vector<128x128xbf16>, vector<16x128xf32> -> vector<16x128xf32>
    %15 = arith.extf %0 : vector<16x128xbf16> to vector<16x128xf32>
    %16 = arith.mulf %14, %15 : vector<16x128xf32>
    %17 = arith.truncf %16 : vector<16x128xf32> to vector<16x128xbf16>
    %c0_6 = arith.constant 0 : index
    %c0_7 = arith.constant 0 : index
    %18 = vector.load %arg2[%c0_6, %c0_7] : memref<16x128xbf16, #tpu.memory_space<vmem>>, vector<16x128xbf16>
    tpu.vector_store %arg2[%c0_6, %c0_7], %17 {strides = array<i32>} : memref<16x128xbf16, #tpu.memory_space<vmem>>, vector<16x128xbf16>,
    return
  }
}

module attributes {stable_mosaic.version = 11 : i64} {
  func.func @_ui_update_kernel(%arg0: i32, %arg1: memref<16x128xbf16, #tpu.memory_space<vmem>>, %arg2: memref<16x16xbf16, #tpu.memory_space<vmem>>, %arg3: memref<16x128xbf16, #tpu.memory_space<vmem>>, %arg4: memref<8x16xbf16, #tpu.memory_space<vmem>>, %arg5: memref<8x128xbf16, #tpu.memory_space<vmem>>, %arg6: memref<5x128x128xbf16, #tpu.memory_space<vmem>>, %arg7: memref<1x128xf32, #tpu.memory_space<vmem>>, %arg8: memref<16x128xf32, #tpu.memory_space<vmem>>) attributes {dimension_semantics = [#tpu.dimension_semantics<parallel>], iteration_bounds = array<i64: 1>, scalar_prefetch = 0 : i64, scratch_operands = 0 : i64, tpu.core_type = #tpu.core_type<tc>, window_params = [{transform_indices = @transform_0, window_bounds = array<i64: 16, 128>}, {transform_indices = @transform_1, window_bounds = array<i64: 16, 16>}, {pipeline_mode = #tpu.pipeline_mode<synchronous>, transform_indices = @transform_2, window_bounds = array<i64: 16, 128>}, {transform_indices = @transform_3, window_bounds = array<i64: 8, 16>}, {pipeline_mode = #tpu.pipeline_mode<synchronous>, transform_indices = @transform_4, window_bounds = array<i64: 8, 128>}, {pipeline_mode = #tpu.pipeline_mode<synchronous>, transform_indices = @transform_5, window_bounds = array<i64: 5, 128, 128>}, {pipeline_mode = #tpu.pipeline_mode<synchronous>, transform_indices = @transform_6, window_bounds = array<i64: 1, 128>}, {transform_indices = @transform_7, window_bounds = array<i64: 16, 128>}]} {
    %c0 = arith.constant 0 : index
    %c0_0 = arith.constant 0 : index
    %0 = vector.load %arg1[%c0, %c0_0] : memref<16x128xbf16, #tpu.memory_space<vmem>>, vector<16x128xbf16>
    %c0_1 = arith.constant 0 : index
    %c0_2 = arith.constant 0 : index
    %1 = vector.load %arg2[%c0_1, %c0_2] : memref<16x16xbf16, #tpu.memory_space<vmem>>, vector<16x16xbf16>
    %c0_3 = arith.constant 0 : index
    %c0_4 = arith.constant 0 : index
    %2 = vector.load %arg3[%c0_3, %c0_4] : memref<16x128xbf16, #tpu.memory_space<vmem>>, vector<16x128xbf16>
    %cst = arith.constant dense<0.000000e+00> : vector<16x128xf32>
    %3 = tpu.matmul %1, %2, %cst {dimension_numbers = #tpu.dot_dimension_numbers<[0], [0], [1], [1], [0, 1, 1, 1], [], []>} : vector<16x16xbf16>, vector<16x128xbf16>, vector<16x128xf32> -> vector<16x128xf32>
    %c0_5 = arith.constant 0 : index
    %c0_6 = arith.constant 0 : index
    %4 = vector.load %arg4[%c0_5, %c0_6] : memref<8x16xbf16, #tpu.memory_space<vmem>>, vector<8x16xbf16>
    %c0_7 = arith.constant 0 : index
    %c0_8 = arith.constant 0 : index
    %5 = vector.load %arg5[%c0_7, %c0_8] : memref<8x128xbf16, #tpu.memory_space<vmem>>, vector<8x128xbf16>
    %cst_9 = arith.constant dense<0.000000e+00> : vector<16x128xf32>
    %6 = tpu.matmul %4, %5, %cst_9 {dimension_numbers = #tpu.dot_dimension_numbers<[0], [0], [1], [1], [0, 1, 1, 1], [], []>} : vector<8x16xbf16>, vector<8x128xbf16>, vector<16x128xf32> -> vector<16x128xf32>
    %7 = arith.extf %0 : vector<16x128xbf16> to vector<16x128xf32>
    %8 = arith.mulf %3, %7 : vector<16x128xf32>
    %9 = arith.extf %0 : vector<16x128xbf16> to vector<16x128xf32>
    %10 = arith.mulf %6, %9 : vector<16x128xf32>
    %c0_10 = arith.constant 0 : index
    %c0_11 = arith.constant 0 : index
    %c0_12 = arith.constant 0 : index
    %11 = vector.load %arg6[%c0_10, %c0_11, %c0_12] : memref<5x128x128xbf16, #tpu.memory_space<vmem>>, vector<1x128x128xbf16>
    %12 = vector.shape_cast %11 : vector<1x128x128xbf16> to vector<128x128xbf16>
    %cst_13 = arith.constant dense<0.000000e+00> : vector<16x128xf32>
    %13 = tpu.matmul %0, %12, %cst_13 {dimension_numbers = #tpu.dot_dimension_numbers<[1], [0], [0], [1], [0, 0, 1, 1], [], []>} : vector<16x128xbf16>, vector<128x128xbf16>, vector<16x128xf32> -> vector<16x128xf32>
    %14 = arith.truncf %3 : vector<16x128xf32> to vector<16x128xbf16>
    %c1 = arith.constant 1 : index
    %c0_14 = arith.constant 0 : index
    %c0_15 = arith.constant 0 : index
    %15 = vector.load %arg6[%c1, %c0_14, %c0_15] : memref<5x128x128xbf16, #tpu.memory_space<vmem>>, vector<1x128x128xbf16>
    %16 = vector.shape_cast %15 : vector<1x128x128xbf16> to vector<128x128xbf16>
    %cst_16 = arith.constant dense<0.000000e+00> : vector<16x128xf32>
    %17 = tpu.matmul %14, %16, %cst_16 {dimension_numbers = #tpu.dot_dimension_numbers<[1], [0], [0], [1], [0, 0, 1, 1], [], []>} : vector<16x128xbf16>, vector<128x128xbf16>, vector<16x128xf32> -> vector<16x128xf32>
    %18 = arith.addf %13, %17 : vector<16x128xf32>
    %19 = arith.truncf %8 : vector<16x128xf32> to vector<16x128xbf16>
    %c2 = arith.constant 2 : index
    %c0_17 = arith.constant 0 : index
    %c0_18 = arith.constant 0 : index
    %20 = vector.load %arg6[%c2, %c0_17, %c0_18] : memref<5x128x128xbf16, #tpu.memory_space<vmem>>, vector<1x128x128xbf16>
    %21 = vector.shape_cast %20 : vector<1x128x128xbf16> to vector<128x128xbf16>
    %cst_19 = arith.constant dense<0.000000e+00> : vector<16x128xf32>
    %22 = tpu.matmul %19, %21, %cst_19 {dimension_numbers = #tpu.dot_dimension_numbers<[1], [0], [0], [1], [0, 0, 1, 1], [], []>} : vector<16x128xbf16>, vector<128x128xbf16>, vector<16x128xf32> -> vector<16x128xf32>
    %23 = arith.addf %18, %22 : vector<16x128xf32>
    %24 = arith.truncf %10 : vector<16x128xf32> to vector<16x128xbf16>
    %c3 = arith.constant 3 : index
    %c0_20 = arith.constant 0 : index
    %c0_21 = arith.constant 0 : index
    %25 = vector.load %arg6[%c3, %c0_20, %c0_21] : memref<5x128x128xbf16, #tpu.memory_space<vmem>>, vector<1x128x128xbf16>
    %26 = vector.shape_cast %25 : vector<1x128x128xbf16> to vector<128x128xbf16>
    %cst_22 = arith.constant dense<0.000000e+00> : vector<16x128xf32>
    %27 = tpu.matmul %24, %26, %cst_22 {dimension_numbers = #tpu.dot_dimension_numbers<[1], [0], [0], [1], [0, 0, 1, 1], [], []>} : vector<16x128xbf16>, vector<128x128xbf16>, vector<16x128xf32> -> vector<16x128xf32>
    %28 = arith.addf %23, %27 : vector<16x128xf32>
    %29 = arith.truncf %6 : vector<16x128xf32> to vector<16x128xbf16>
    %c4 = arith.constant 4 : index
    %c0_23 = arith.constant 0 : index
    %c0_24 = arith.constant 0 : index
    %30 = vector.load %arg6[%c4, %c0_23, %c0_24] : memref<5x128x128xbf16, #tpu.memory_space<vmem>>, vector<1x128x128xbf16>
    %31 = vector.shape_cast %30 : vector<1x128x128xbf16> to vector<128x128xbf16>
    %cst_25 = arith.constant dense<0.000000e+00> : vector<16x128xf32>
    %32 = tpu.matmul %29, %31, %cst_25 {dimension_numbers = #tpu.dot_dimension_numbers<[1], [0], [0], [1], [0, 0, 1, 1], [], []>} : vector<16x128xbf16>, vector<128x128xbf16>, vector<16x128xf32> -> vector<16x128xf32>
    %33 = arith.addf %28, %32 : vector<16x128xf32>
    %c0_26 = arith.constant 0 : index
    %c0_27 = arith.constant 0 : index
    %34 = vector.load %arg7[%c0_26, %c0_27] : memref<1x128xf32, #tpu.memory_space<vmem>>, vector<1x128xf32>
    %35 = vector.broadcast %34 : vector<1x128xf32> to vector<16x128xf32>
    %36 = arith.addf %33, %35 : vector<16x128xf32>
    %cst_28 = arith.constant 0.000000e+00 : f32
    %37 = vector.broadcast %cst_28 : f32 to vector<16x128xf32>
    %38 = arith.cmpf oge, %36, %37 : vector<16x128xf32>
    %cst_29 = arith.constant 0.00999999977 : f32
    %39 = vector.broadcast %cst_29 : f32 to vector<16x128xf32>
    %40 = arith.mulf %39, %36 : vector<16x128xf32>
    %41 = arith.select %38, %36, %40 : vector<16x128xi1>, vector<16x128xf32>
    %42 = arith.mulf %41, %41 : vector<16x128xf32>
    %cst_30 = arith.constant dense<0.000000e+00> : vector<16xf32>
    %43 = vector.multi_reduction <add>, %42, %cst_30 [1] : vector<16x128xf32> to vector<16xf32>
    %44 = vector.shape_cast %43 : vector<16xf32> to vector<16x1xf32>
    %cst_31 = arith.constant 1.000000e-24 : f32
    %45 = vector.broadcast %cst_31 : f32 to vector<16x1xf32>
    %46 = arith.maximumf %44, %45 : vector<16x1xf32>
    %47 = math.rsqrt %46 : vector<16x1xf32>
    %48 = vector.broadcast %47 : vector<16x1xf32> to vector<16x128xf32>
    %49 = arith.mulf %41, %48 : vector<16x128xf32>
    %c0_32 = arith.constant 0 : index
    %c0_33 = arith.constant 0 : index
    %50 = vector.load %arg8[%c0_32, %c0_33] : memref<16x128xf32, #tpu.memory_space<vmem>>, vector<16x128xf32>
    tpu.vector_store %arg8[%c0_32, %c0_33], %49 {strides = array<i32>} : memref<16x128xf32, #tpu.memory_space<vmem>>, vector<16x128xf32>,
    return
  }
  func.func @transform_0(%arg0: i32) -> (i32, i32) {
    %c0_i32 = arith.constant 0 : i32
    %c0_i32_0 = arith.constant 0 : i32
    return %arg0, %c0_i32 : i32, i32
  }
  func.func @transform_1(%arg0: i32) -> (i32, i32) {
    %c0_i32 = arith.constant 0 : i32
    %c0_i32_0 = arith.constant 0 : i32
    return %c0_i32, %arg0 : i32, i32
  }
  func.func @transform_2(%arg0: i32) -> (i32, i32) {
    %c0_i32 = arith.constant 0 : i32
    %c0_i32_0 = arith.constant 0 : i32
    %c0_i32_1 = arith.constant 0 : i32
    return %c0_i32, %c0_i32_0 : i32, i32
  }
  func.func @transform_3(%arg0: i32) -> (i32, i32) {
    %c0_i32 = arith.constant 0 : i32
    %c0_i32_0 = arith.constant 0 : i32
    return %c0_i32, %arg0 : i32, i32
  }
  func.func @transform_4(%arg0: i32) -> (i32, i32) {
    %c0_i32 = arith.constant 0 : i32
    %c0_i32_0 = arith.constant 0 : i32
    %c0_i32_1 = arith.constant 0 : i32
    return %c0_i32, %c0_i32_0 : i32, i32
  }
  func.func @transform_5(%arg0: i32) -> (i32, i32, i32) {
    %c0_i32 = arith.constant 0 : i32
    %c0_i32_0 = arith.constant 0 : i32
    %c0_i32_1 = arith.constant 0 : i32
    %c0_i32_2 = arith.constant 0 : i32
    return %c0_i32, %c0_i32_0, %c0_i32_1 : i32, i32, i32
  }
  func.func @transform_6(%arg0: i32) -> (i32, i32) {
    %c0_i32 = arith.constant 0 : i32
    %c0_i32_0 = arith.constant 0 : i32
    %c0_i32_1 = arith.constant 0 : i32
    return %c0_i32, %c0_i32_0 : i32, i32
  }
  func.func @transform_7(%arg0: i32) -> (i32, i32) {
    %c0_i32 = arith.constant 0 : i32
    %c0_i32_0 = arith.constant 0 : i32
    return %arg0, %c0_i32 : i32, i32
  }
}

module attributes {stable_mosaic.version = 11 : i64} {
  func.func @_ui_update_kernel(%arg0: i32, %arg1: memref<16x128xbf16, #tpu.memory_space<vmem>>, %arg2: memref<16x16xbf16, #tpu.memory_space<vmem>>, %arg3: memref<16x128xbf16, #tpu.memory_space<vmem>>, %arg4: memref<8x16xbf16, #tpu.memory_space<vmem>>, %arg5: memref<8x128xbf16, #tpu.memory_space<vmem>>, %arg6: memref<5x128x128xbf16, #tpu.memory_space<vmem>>, %arg7: memref<1x128xf32, #tpu.memory_space<vmem>>, %arg8: memref<16x128xf32, #tpu.memory_space<vmem>>) attributes {dimension_semantics = [#tpu.dimension_semantics<parallel>], iteration_bounds = array<i64: 1>, scalar_prefetch = 0 : i64, scratch_operands = 0 : i64, tpu.core_type = #tpu.core_type<tc>, window_params = [{transform_indices = @transform_0, window_bounds = array<i64: 16, 128>}, {transform_indices = @transform_1, window_bounds = array<i64: 16, 16>}, {pipeline_mode = #tpu.pipeline_mode<synchronous>, transform_indices = @transform_2, window_bounds = array<i64: 16, 128>}, {transform_indices = @transform_3, window_bounds = array<i64: 8, 16>}, {pipeline_mode = #tpu.pipeline_mode<synchronous>, transform_indices = @transform_4, window_bounds = array<i64: 8, 128>}, {pipeline_mode = #tpu.pipeline_mode<synchronous>, transform_indices = @transform_5, window_bounds = array<i64: 5, 128, 128>}, {pipeline_mode = #tpu.pipeline_mode<synchronous>, transform_indices = @transform_6, window_bounds = array<i64: 1, 128>}, {transform_indices = @transform_7, window_bounds = array<i64: 16, 128>}]} {
    %c0 = arith.constant 0 : index
    %c0_0 = arith.constant 0 : index
    %0 = vector.load %arg1[%c0, %c0_0] : memref<16x128xbf16, #tpu.memory_space<vmem>>, vector<16x128xbf16>
    %c0_1 = arith.constant 0 : index
    %c0_2 = arith.constant 0 : index
    %1 = vector.load %arg2[%c0_1, %c0_2] : memref<16x16xbf16, #tpu.memory_space<vmem>>, vector<16x16xbf16>
    %c0_3 = arith.constant 0 : index
    %c0_4 = arith.constant 0 : index
    %2 = vector.load %arg3[%c0_3, %c0_4] : memref<16x128xbf16, #tpu.memory_space<vmem>>, vector<16x128xbf16>
    %cst = arith.constant dense<0.000000e+00> : vector<16x128xf32>
    %3 = tpu.matmul %1, %2, %cst {dimension_numbers = #tpu.dot_dimension_numbers<[1], [0], [0], [1], [0, 0, 1, 1], [], []>} : vector<16x16xbf16>, vector<16x128xbf16>, vector<16x128xf32> -> vector<16x128xf32>
    %c0_5 = arith.constant 0 : index
    %c0_6 = arith.constant 0 : index
    %4 = vector.load %arg4[%c0_5, %c0_6] : memref<8x16xbf16, #tpu.memory_space<vmem>>, vector<8x16xbf16>
    %c0_7 = arith.constant 0 : index
    %c0_8 = arith.constant 0 : index
    %5 = vector.load %arg5[%c0_7, %c0_8] : memref<8x128xbf16, #tpu.memory_space<vmem>>, vector<8x128xbf16>
    %cst_9 = arith.constant dense<0.000000e+00> : vector<16x128xf32>
    %6 = tpu.matmul %4, %5, %cst_9 {dimension_numbers = #tpu.dot_dimension_numbers<[0], [0], [1], [1], [0, 1, 1, 1], [], []>} : vector<8x16xbf16>, vector<8x128xbf16>, vector<16x128xf32> -> vector<16x128xf32>
    %7 = arith.extf %0 : vector<16x128xbf16> to vector<16x128xf32>
    %8 = arith.mulf %3, %7 : vector<16x128xf32>
    %9 = arith.extf %0 : vector<16x128xbf16> to vector<16x128xf32>
    %10 = arith.mulf %6, %9 : vector<16x128xf32>
    %c0_10 = arith.constant 0 : index
    %c0_11 = arith.constant 0 : index
    %c0_12 = arith.constant 0 : index
    %11 = vector.load %arg6[%c0_10, %c0_11, %c0_12] : memref<5x128x128xbf16, #tpu.memory_space<vmem>>, vector<1x128x128xbf16>
    %12 = vector.shape_cast %11 : vector<1x128x128xbf16> to vector<128x128xbf16>
    %cst_13 = arith.constant dense<0.000000e+00> : vector<16x128xf32>
    %13 = tpu.matmul %0, %12, %cst_13 {dimension_numbers = #tpu.dot_dimension_numbers<[1], [0], [0], [1], [0, 0, 1, 1], [], []>} : vector<16x128xbf16>, vector<128x128xbf16>, vector<16x128xf32> -> vector<16x128xf32>
    %14 = arith.truncf %3 : vector<16x128xf32> to vector<16x128xbf16>
    %c1 = arith.constant 1 : index
    %c0_14 = arith.constant 0 : index
    %c0_15 = arith.constant 0 : index
    %15 = vector.load %arg6[%c1, %c0_14, %c0_15] : memref<5x128x128xbf16, #tpu.memory_space<vmem>>, vector<1x128x128xbf16>
    %16 = vector.shape_cast %15 : vector<1x128x128xbf16> to vector<128x128xbf16>
    %cst_16 = arith.constant dense<0.000000e+00> : vector<16x128xf32>
    %17 = tpu.matmul %14, %16, %cst_16 {dimension_numbers = #tpu.dot_dimension_numbers<[1], [0], [0], [1], [0, 0, 1, 1], [], []>} : vector<16x128xbf16>, vector<128x128xbf16>, vector<16x128xf32> -> vector<16x128xf32>
    %18 = arith.addf %13, %17 : vector<16x128xf32>
    %19 = arith.truncf %8 : vector<16x128xf32> to vector<16x128xbf16>
    %c2 = arith.constant 2 : index
    %c0_17 = arith.constant 0 : index
    %c0_18 = arith.constant 0 : index
    %20 = vector.load %arg6[%c2, %c0_17, %c0_18] : memref<5x128x128xbf16, #tpu.memory_space<vmem>>, vector<1x128x128xbf16>
    %21 = vector.shape_cast %20 : vector<1x128x128xbf16> to vector<128x128xbf16>
    %cst_19 = arith.constant dense<0.000000e+00> : vector<16x128xf32>
    %22 = tpu.matmul %19, %21, %cst_19 {dimension_numbers = #tpu.dot_dimension_numbers<[1], [0], [0], [1], [0, 0, 1, 1], [], []>} : vector<16x128xbf16>, vector<128x128xbf16>, vector<16x128xf32> -> vector<16x128xf32>
    %23 = arith.addf %18, %22 : vector<16x128xf32>
    %24 = arith.truncf %10 : vector<16x128xf32> to vector<16x128xbf16>
    %c3 = arith.constant 3 : index
    %c0_20 = arith.constant 0 : index
    %c0_21 = arith.constant 0 : index
    %25 = vector.load %arg6[%c3, %c0_20, %c0_21] : memref<5x128x128xbf16, #tpu.memory_space<vmem>>, vector<1x128x128xbf16>
    %26 = vector.shape_cast %25 : vector<1x128x128xbf16> to vector<128x128xbf16>
    %cst_22 = arith.constant dense<0.000000e+00> : vector<16x128xf32>
    %27 = tpu.matmul %24, %26, %cst_22 {dimension_numbers = #tpu.dot_dimension_numbers<[1], [0], [0], [1], [0, 0, 1, 1], [], []>} : vector<16x128xbf16>, vector<128x128xbf16>, vector<16x128xf32> -> vector<16x128xf32>
    %28 = arith.addf %23, %27 : vector<16x128xf32>
    %29 = arith.truncf %6 : vector<16x128xf32> to vector<16x128xbf16>
    %c4 = arith.constant 4 : index
    %c0_23 = arith.constant 0 : index
    %c0_24 = arith.constant 0 : index
    %30 = vector.load %arg6[%c4, %c0_23, %c0_24] : memref<5x128x128xbf16, #tpu.memory_space<vmem>>, vector<1x128x128xbf16>
    %31 = vector.shape_cast %30 : vector<1x128x128xbf16> to vector<128x128xbf16>
    %cst_25 = arith.constant dense<0.000000e+00> : vector<16x128xf32>
    %32 = tpu.matmul %29, %31, %cst_25 {dimension_numbers = #tpu.dot_dimension_numbers<[1], [0], [0], [1], [0, 0, 1, 1], [], []>} : vector<16x128xbf16>, vector<128x128xbf16>, vector<16x128xf32> -> vector<16x128xf32>
    %33 = arith.addf %28, %32 : vector<16x128xf32>
    %c0_26 = arith.constant 0 : index
    %c0_27 = arith.constant 0 : index
    %34 = vector.load %arg7[%c0_26, %c0_27] : memref<1x128xf32, #tpu.memory_space<vmem>>, vector<1x128xf32>
    %35 = vector.broadcast %34 : vector<1x128xf32> to vector<16x128xf32>
    %36 = arith.addf %33, %35 : vector<16x128xf32>
    %cst_28 = arith.constant 0.000000e+00 : f32
    %37 = vector.broadcast %cst_28 : f32 to vector<16x128xf32>
    %38 = arith.cmpf oge, %36, %37 : vector<16x128xf32>
    %cst_29 = arith.constant 0.00999999977 : f32
    %39 = vector.broadcast %cst_29 : f32 to vector<16x128xf32>
    %40 = arith.mulf %39, %36 : vector<16x128xf32>
    %41 = arith.select %38, %36, %40 : vector<16x128xi1>, vector<16x128xf32>
    %42 = arith.mulf %41, %41 : vector<16x128xf32>
    %cst_30 = arith.constant dense<0.000000e+00> : vector<16xf32>
    %43 = vector.multi_reduction <add>, %42, %cst_30 [1] : vector<16x128xf32> to vector<16xf32>
    %44 = vector.shape_cast %43 : vector<16xf32> to vector<16x1xf32>
    %cst_31 = arith.constant 1.000000e-24 : f32
    %45 = vector.broadcast %cst_31 : f32 to vector<16x1xf32>
    %46 = arith.maximumf %44, %45 : vector<16x1xf32>
    %47 = math.rsqrt %46 : vector<16x1xf32>
    %48 = vector.broadcast %47 : vector<16x1xf32> to vector<16x128xf32>
    %49 = arith.mulf %41, %48 : vector<16x128xf32>
    %c0_32 = arith.constant 0 : index
    %c0_33 = arith.constant 0 : index
    %50 = vector.load %arg8[%c0_32, %c0_33] : memref<16x128xf32, #tpu.memory_space<vmem>>, vector<16x128xf32>
    tpu.vector_store %arg8[%c0_32, %c0_33], %49 {strides = array<i32>} : memref<16x128xf32, #tpu.memory_space<vmem>>, vector<16x128xf32>,
    return
  }
  func.func @transform_0(%arg0: i32) -> (i32, i32) {
    %c0_i32 = arith.constant 0 : i32
    %c0_i32_0 = arith.constant 0 : i32
    return %arg0, %c0_i32 : i32, i32
  }
  func.func @transform_1(%arg0: i32) -> (i32, i32) {
    %c0_i32 = arith.constant 0 : i32
    %c0_i32_0 = arith.constant 0 : i32
    return %arg0, %c0_i32 : i32, i32
  }
  func.func @transform_2(%arg0: i32) -> (i32, i32) {
    %c0_i32 = arith.constant 0 : i32
    %c0_i32_0 = arith.constant 0 : i32
    %c0_i32_1 = arith.constant 0 : i32
    return %c0_i32, %c0_i32_0 : i32, i32
  }
  func.func @transform_3(%arg0: i32) -> (i32, i32) {
    %c0_i32 = arith.constant 0 : i32
    %c0_i32_0 = arith.constant 0 : i32
    return %c0_i32, %arg0 : i32, i32
  }
  func.func @transform_4(%arg0: i32) -> (i32, i32) {
    %c0_i32 = arith.constant 0 : i32
    %c0_i32_0 = arith.constant 0 : i32
    %c0_i32_1 = arith.constant 0 : i32
    return %c0_i32, %c0_i32_0 : i32, i32
  }
  func.func @transform_5(%arg0: i32) -> (i32, i32, i32) {
    %c0_i32 = arith.constant 0 : i32
    %c0_i32_0 = arith.constant 0 : i32
    %c0_i32_1 = arith.constant 0 : i32
    %c0_i32_2 = arith.constant 0 : i32
    return %c0_i32, %c0_i32_0, %c0_i32_1 : i32, i32, i32
  }
  func.func @transform_6(%arg0: i32) -> (i32, i32) {
    %c0_i32 = arith.constant 0 : i32
    %c0_i32_0 = arith.constant 0 : i32
    %c0_i32_1 = arith.constant 0 : i32
    return %c0_i32, %c0_i32_0 : i32, i32
  }
  func.func @transform_7(%arg0: i32) -> (i32, i32) {
    %c0_i32 = arith.constant 0 : i32
    %c0_i32_0 = arith.constant 0 : i32
    return %arg0, %c0_i32 : i32, i32
  }
}

module attributes {stable_mosaic.version = 11 : i64} {
  func.func @_group_update_kernel(%arg0: i32, %arg1: memref<8x128xbf16, #tpu.memory_space<vmem>>, %arg2: memref<8x16xbf16, #tpu.memory_space<vmem>>, %arg3: memref<16x128xbf16, #tpu.memory_space<vmem>>, %arg4: memref<8x16xbf16, #tpu.memory_space<vmem>>, %arg5: memref<16x128xbf16, #tpu.memory_space<vmem>>, %arg6: memref<16x128xbf16, #tpu.memory_space<vmem>>, %arg7: memref<5x128x128xbf16, #tpu.memory_space<vmem>>, %arg8: memref<1x128xf32, #tpu.memory_space<vmem>>, %arg9: memref<8x128xf32, #tpu.memory_space<vmem>>) attributes {dimension_semantics = [#tpu.dimension_semantics<parallel>], iteration_bounds = array<i64: 1>, scalar_prefetch = 0 : i64, scratch_operands = 0 : i64, tpu.core_type = #tpu.core_type<tc>, window_params = [{transform_indices = @transform_0, window_bounds = array<i64: 8, 128>}, {transform_indices = @transform_1, window_bounds = array<i64: 8, 16>}, {pipeline_mode = #tpu.pipeline_mode<synchronous>, transform_indices = @transform_2, window_bounds = array<i64: 16, 128>}, {transform_indices = @transform_3, window_bounds = array<i64: 8, 16>}, {pipeline_mode = #tpu.pipeline_mode<synchronous>, transform_indices = @transform_4, window_bounds = array<i64: 16, 128>}, {pipeline_mode = #tpu.pipeline_mode<synchronous>, transform_indices = @transform_5, window_bounds = array<i64: 16, 128>}, {pipeline_mode = #tpu.pipeline_mode<synchronous>, transform_indices = @transform_6, window_bounds = array<i64: 5, 128, 128>}, {pipeline_mode = #tpu.pipeline_mode<synchronous>, transform_indices = @transform_7, window_bounds = array<i64: 1, 128>}, {transform_indices = @transform_8, window_bounds = array<i64: 8, 128>}]} {
    %c0 = arith.constant 0 : index
    %c0_0 = arith.constant 0 : index
    %0 = vector.load %arg1[%c0, %c0_0] : memref<8x128xbf16, #tpu.memory_space<vmem>>, vector<8x128xbf16>
    %c0_1 = arith.constant 0 : index
    %c0_2 = arith.constant 0 : index
    %1 = vector.load %arg2[%c0_1, %c0_2] : memref<8x16xbf16, #tpu.memory_space<vmem>>, vector<8x16xbf16>
    %c0_3 = arith.constant 0 : index
    %c0_4 = arith.constant 0 : index
    %2 = vector.load %arg3[%c0_3, %c0_4] : memref<16x128xbf16, #tpu.memory_space<vmem>>, vector<16x128xbf16>
    %cst = arith.constant dense<0.000000e+00> : vector<8x128xf32>
    %3 = tpu.matmul %1, %2, %cst {dimension_numbers = #tpu.dot_dimension_numbers<[1], [0], [0], [1], [0, 0, 1, 1], [], []>} : vector<8x16xbf16>, vector<16x128xbf16>, vector<8x128xf32> -> vector<8x128xf32>
    %c0_5 = arith.constant 0 : index
    %c0_6 = arith.constant 0 : index
    %4 = vector.load %arg4[%c0_5, %c0_6] : memref<8x16xbf16, #tpu.memory_space<vmem>>, vector<8x16xbf16>
    %c0_7 = arith.constant 0 : index
    %c0_8 = arith.constant 0 : index
    %5 = vector.load %arg5[%c0_7, %c0_8] : memref<16x128xbf16, #tpu.memory_space<vmem>>, vector<16x128xbf16>
    %cst_9 = arith.constant dense<0.000000e+00> : vector<8x128xf32>
    %6 = tpu.matmul %4, %5, %cst_9 {dimension_numbers = #tpu.dot_dimension_numbers<[1], [0], [0], [1], [0, 0, 1, 1], [], []>} : vector<8x16xbf16>, vector<16x128xbf16>, vector<8x128xf32> -> vector<8x128xf32>
    %c0_10 = arith.constant 0 : index
    %c0_11 = arith.constant 0 : index
    %7 = vector.load %arg2[%c0_10, %c0_11] : memref<8x16xbf16, #tpu.memory_space<vmem>>, vector<8x16xbf16>
    %c0_12 = arith.constant 0 : index
    %c0_13 = arith.constant 0 : index
    %8 = vector.load %arg6[%c0_12, %c0_13] : memref<16x128xbf16, #tpu.memory_space<vmem>>, vector<16x128xbf16>
    %cst_14 = arith.constant dense<0.000000e+00> : vector<8x128xf32>
    %9 = tpu.matmul %7, %8, %cst_14 {dimension_numbers = #tpu.dot_dimension_numbers<[1], [0], [0], [1], [0, 0, 1, 1], [], []>} : vector<8x16xbf16>, vector<16x128xbf16>, vector<8x128xf32> -> vector<8x128xf32>
    %10 = arith.extf %0 : vector<8x128xbf16> to vector<8x128xf32>
    %11 = arith.mulf %6, %10 : vector<8x128xf32>
    %12 = arith.extf %0 : vector<8x128xbf16> to vector<8x128xf32>
    %13 = arith.mulf %3, %12 : vector<8x128xf32>
    %c0_15 = arith.constant 0 : index
    %c0_16 = arith.constant 0 : index
    %c0_17 = arith.constant 0 : index
    %14 = vector.load %arg7[%c0_15, %c0_16, %c0_17] : memref<5x128x128xbf16, #tpu.memory_space<vmem>>, vector<1x128x128xbf16>
    %15 = vector.shape_cast %14 : vector<1x128x128xbf16> to vector<128x128xbf16>
    %cst_18 = arith.constant dense<0.000000e+00> : vector<8x128xf32>
    %16 = tpu.matmul %0, %15, %cst_18 {dimension_numbers = #tpu.dot_dimension_numbers<[1], [0], [0], [1], [0, 0, 1, 1], [], []>} : vector<8x128xbf16>, vector<128x128xbf16>, vector<8x128xf32> -> vector<8x128xf32>
    %17 = arith.truncf %3 : vector<8x128xf32> to vector<8x128xbf16>
    %c1 = arith.constant 1 : index
    %c0_19 = arith.constant 0 : index
    %c0_20 = arith.constant 0 : index
    %18 = vector.load %arg7[%c1, %c0_19, %c0_20] : memref<5x128x128xbf16, #tpu.memory_space<vmem>>, vector<1x128x128xbf16>
    %19 = vector.shape_cast %18 : vector<1x128x128xbf16> to vector<128x128xbf16>
    %cst_21 = arith.constant dense<0.000000e+00> : vector<8x128xf32>
    %20 = tpu.matmul %17, %19, %cst_21 {dimension_numbers = #tpu.dot_dimension_numbers<[1], [0], [0], [1], [0, 0, 1, 1], [], []>} : vector<8x128xbf16>, vector<128x128xbf16>, vector<8x128xf32> -> vector<8x128xf32>
    %21 = arith.addf %16, %20 : vector<8x128xf32>
    %22 = arith.truncf %11 : vector<8x128xf32> to vector<8x128xbf16>
    %c2 = arith.constant 2 : index
    %c0_22 = arith.constant 0 : index
    %c0_23 = arith.constant 0 : index
    %23 = vector.load %arg7[%c2, %c0_22, %c0_23] : memref<5x128x128xbf16, #tpu.memory_space<vmem>>, vector<1x128x128xbf16>
    %24 = vector.shape_cast %23 : vector<1x128x128xbf16> to vector<128x128xbf16>
    %cst_24 = arith.constant dense<0.000000e+00> : vector<8x128xf32>
    %25 = tpu.matmul %22, %24, %cst_24 {dimension_numbers = #tpu.dot_dimension_numbers<[1], [0], [0], [1], [0, 0, 1, 1], [], []>} : vector<8x128xbf16>, vector<128x128xbf16>, vector<8x128xf32> -> vector<8x128xf32>
    %26 = arith.addf %21, %25 : vector<8x128xf32>
    %27 = arith.truncf %13 : vector<8x128xf32> to vector<8x128xbf16>
    %c3 = arith.constant 3 : index
    %c0_25 = arith.constant 0 : index
    %c0_26 = arith.constant 0 : index
    %28 = vector.load %arg7[%c3, %c0_25, %c0_26] : memref<5x128x128xbf16, #tpu.memory_space<vmem>>, vector<1x128x128xbf16>
    %29 = vector.shape_cast %28 : vector<1x128x128xbf16> to vector<128x128xbf16>
    %cst_27 = arith.constant dense<0.000000e+00> : vector<8x128xf32>
    %30 = tpu.matmul %27, %29, %cst_27 {dimension_numbers = #tpu.dot_dimension_numbers<[1], [0], [0], [1], [0, 0, 1, 1], [], []>} : vector<8x128xbf16>, vector<128x128xbf16>, vector<8x128xf32> -> vector<8x128xf32>
    %31 = arith.addf %26, %30 : vector<8x128xf32>
    %32 = arith.truncf %9 : vector<8x128xf32> to vector<8x128xbf16>
    %c4 = arith.constant 4 : index
    %c0_28 = arith.constant 0 : index
    %c0_29 = arith.constant 0 : index
    %33 = vector.load %arg7[%c4, %c0_28, %c0_29] : memref<5x128x128xbf16, #tpu.memory_space<vmem>>, vector<1x128x128xbf16>
    %34 = vector.shape_cast %33 : vector<1x128x128xbf16> to vector<128x128xbf16>
    %cst_30 = arith.constant dense<0.000000e+00> : vector<8x128xf32>
    %35 = tpu.matmul %32, %34, %cst_30 {dimension_numbers = #tpu.dot_dimension_numbers<[1], [0], [0], [1], [0, 0, 1, 1], [], []>} : vector<8x128xbf16>, vector<128x128xbf16>, vector<8x128xf32> -> vector<8x128xf32>
    %36 = arith.addf %31, %35 : vector<8x128xf32>
    %c0_31 = arith.constant 0 : index
    %c0_32 = arith.constant 0 : index
    %37 = vector.load %arg8[%c0_31, %c0_32] : memref<1x128xf32, #tpu.memory_space<vmem>>, vector<1x128xf32>
    %38 = vector.broadcast %37 : vector<1x128xf32> to vector<8x128xf32>
    %39 = arith.addf %36, %38 : vector<8x128xf32>
    %cst_33 = arith.constant 0.000000e+00 : f32
    %40 = vector.broadcast %cst_33 : f32 to vector<8x128xf32>
    %41 = arith.cmpf oge, %39, %40 : vector<8x128xf32>
    %cst_34 = arith.constant 0.00999999977 : f32
    %42 = vector.broadcast %cst_34 : f32 to vector<8x128xf32>
    %43 = arith.mulf %42, %39 : vector<8x128xf32>
    %44 = arith.select %41, %39, %43 : vector<8x128xi1>, vector<8x128xf32>
    %45 = arith.mulf %44, %44 : vector<8x128xf32>
    %cst_35 = arith.constant dense<0.000000e+00> : vector<8xf32>
    %46 = vector.multi_reduction <add>, %45, %cst_35 [1] : vector<8x128xf32> to vector<8xf32>
    %47 = vector.shape_cast %46 : vector<8xf32> to vector<8x1xf32>
    %cst_36 = arith.constant 1.000000e-24 : f32
    %48 = vector.broadcast %cst_36 : f32 to vector<8x1xf32>
    %49 = arith.maximumf %47, %48 : vector<8x1xf32>
    %50 = math.rsqrt %49 : vector<8x1xf32>
    %51 = vector.broadcast %50 : vector<8x1xf32> to vector<8x128xf32>
    %52 = arith.mulf %44, %51 : vector<8x128xf32>
    %c0_37 = arith.constant 0 : index
    %c0_38 = arith.constant 0 : index
    %53 = vector.load %arg9[%c0_37, %c0_38] : memref<8x128xf32, #tpu.memory_space<vmem>>, vector<8x128xf32>
    tpu.vector_store %arg9[%c0_37, %c0_38], %52 {strides = array<i32>} : memref<8x128xf32, #tpu.memory_space<vmem>>, vector<8x128xf32>,
    return
  }
  func.func @transform_0(%arg0: i32) -> (i32, i32) {
    %c0_i32 = arith.constant 0 : i32
    %c0_i32_0 = arith.constant 0 : i32
    return %arg0, %c0_i32 : i32, i32
  }
  func.func @transform_1(%arg0: i32) -> (i32, i32) {
    %c0_i32 = arith.constant 0 : i32
    %c0_i32_0 = arith.constant 0 : i32
    return %arg0, %c0_i32 : i32, i32
  }
  func.func @transform_2(%arg0: i32) -> (i32, i32) {
    %c0_i32 = arith.constant 0 : i32
    %c0_i32_0 = arith.constant 0 : i32
    %c0_i32_1 = arith.constant 0 : i32
    return %c0_i32, %c0_i32_0 : i32, i32
  }
  func.func @transform_3(%arg0: i32) -> (i32, i32) {
    %c0_i32 = arith.constant 0 : i32
    %c0_i32_0 = arith.constant 0 : i32
    return %arg0, %c0_i32 : i32, i32
  }
  func.func @transform_4(%arg0: i32) -> (i32, i32) {
    %c0_i32 = arith.constant 0 : i32
    %c0_i32_0 = arith.constant 0 : i32
    %c0_i32_1 = arith.constant 0 : i32
    return %c0_i32, %c0_i32_0 : i32, i32
  }
  func.func @transform_5(%arg0: i32) -> (i32, i32) {
    %c0_i32 = arith.constant 0 : i32
    %c0_i32_0 = arith.constant 0 : i32
    %c0_i32_1 = arith.constant 0 : i32
    return %c0_i32, %c0_i32_0 : i32, i32
  }
  func.func @transform_6(%arg0: i32) -> (i32, i32, i32) {
    %c0_i32 = arith.constant 0 : i32
    %c0_i32_0 = arith.constant 0 : i32
    %c0_i32_1 = arith.constant 0 : i32
    %c0_i32_2 = arith.constant 0 : i32
    return %c0_i32, %c0_i32_0, %c0_i32_1 : i32, i32, i32
  }
  func.func @transform_7(%arg0: i32) -> (i32, i32) {
    %c0_i32 = arith.constant 0 : i32
    %c0_i32_0 = arith.constant 0 : i32
    %c0_i32_1 = arith.constant 0 : i32
    return %c0_i32, %c0_i32_0 : i32, i32
  }
  func.func @transform_8(%arg0: i32) -> (i32, i32) {
    %c0_i32 = arith.constant 0 : i32
    %c0_i32_0 = arith.constant 0 : i32
    return %arg0, %c0_i32 : i32, i32
  }
}

</mosaic_0001>

<bundles_post_ra>
// kernel: gnn_layer_forward.4
= control target key start
LH: loop header
LB: loop body
LE: loop exit
PB: predicated region body
PF: predicated region fallthrough
CT: control target
= control target key end

     0   :  { %v302_v0 = vmov 0.0   ;;  %vm303_vm0 = vmmov 0   ;;  %s349_s1 = inlined_call_operand.vmem [shape: bf16[128,128], index: 1, kind: input, shape index: {}]   ;;  %s350_s0 = inlined_call_operand.vmem [shape: bf16[16,128], index: 0, kind: input, shape index: {}]   ;;  %s351_s2 = inlined_call_operand.vmem [shape: bf16[16,128], index: 2, kind: output, shape index: {}]  }
   0x1   :  { %244 = vmatprep.subr.bf16.mxu0 %v302_v0  ;;  %v286_v1 = vld [vmem:[%s349_s1] sm:$0xff]   ;;  %260 = vmatprep.mubr.msk.bf16.mxu0 %vm303_vm0, %v302_v0  ;;  %v287_v2 = vld [vmem:[%s349_s1 + $0x8] sm:$0xff]   ;;  %v288_v3 = vld [vmem:[%s349_s1 + $0x10] sm:$0xff]  }
   0x2   :  { %264 = vmatprep.subr.bf16.mxu1 %v302_v0  ;;  %280 = vmatprep.mubr.msk.bf16.mxu1 %vm303_vm0, %v302_v0  ;;  %v289_v4 = vld [vmem:[%s349_s1 + $0x18] sm:$0xff]   ;;  %v290_v5 = vld [vmem:[%s349_s1 + $0x20] sm:$0xff]   ;;  %v291_v6 = vld [vmem:[%s349_s1 + $0x28] sm:$0xff]  }
   0x3   :  { %245 = vmatpush3.bf16.xpose.msra.mxu0 %v286_v1  ;;  %265 = vmatpush3.bf16.msra.mxu1 %v286_v1  ;;  %v292_v7 = vld [vmem:[%s349_s1 + $0x30] sm:$0xff]   ;;  %v293_v8 = vld [vmem:[%s349_s1 + $0x38] sm:$0xff]   ;;  %v12_v9 = vld [vmem:[%s350_s0] sm:$0xff]  }
   0x4   :  { %246 = vmatprep.subr.bf16.mxu0 %v302_v0  ;;  %266 = vmatprep.subr.bf16.mxu1 %v302_v0  ;;  %v190_v38 = vunpack.c.l.bf16 %v12_v9  ;;  %v191_v39 = vunpack.c.h.bf16 %v12_v9 }
   0x7   :  { %267 = vmatpush3.bf16.msra.mxu1 %v287_v2 }
   0x8   :  { %268 = vmatprep.subr.bf16.mxu1 %v302_v0 }
   0xb   :  { %247 = vmatpush3.bf16.xpose.msra.mxu0 %v287_v2  ;;  %269 = vmatpush3.bf16.msra.mxu1 %v288_v3 }
   0xc   :  { %248 = vmatprep.subr.bf16.mxu0 %v302_v0  ;;  %270 = vmatprep.subr.bf16.mxu1 %v302_v0 }
   0xf   :  { %271 = vmatpush3.bf16.msra.mxu1 %v289_v4 }
  0x10   :  { %272 = vmatprep.subr.bf16.mxu1 %v302_v0 }
  0x13   :  { %249 = vmatpush3.bf16.xpose.msra.mxu0 %v288_v3  ;;  %273 = vmatpush3.bf16.msra.mxu1 %v290_v5 }
  0x14   :  { %250 = vmatprep.subr.bf16.mxu0 %v302_v0  ;;  %274 = vmatprep.subr.bf16.mxu1 %v302_v0 }
  0x17   :  { %275 = vmatpush3.bf16.msra.mxu1 %v291_v6 }
  0x18   :  { %276 = vmatprep.subr.bf16.mxu1 %v302_v0 }
  0x1b   :  { %251 = vmatpush3.bf16.xpose.msra.mxu0 %v289_v4  ;;  %277 = vmatpush3.bf16.msra.mxu1 %v292_v7 }
  0x1c   :  { %252 = vmatprep.subr.bf16.mxu0 %v302_v0  ;;  %278 = vmatprep.subr.bf16.mxu1 %v302_v0 }
  0x1f   :  { %279 = vmatpush3.bf16.msra.mxu1 %v293_v8 }
  0x23   :  { %253 = vmatpush3.bf16.xpose.msra.mxu0 %v290_v5 }
  0x24   :  { %254 = vmatprep.subr.bf16.mxu0 %v302_v0 }
  0x2b   :  { %255 = vmatpush3.bf16.xpose.msra.mxu0 %v291_v6 }
  0x2c   :  { %256 = vmatprep.subr.bf16.mxu0 %v302_v0 }
  0x33   :  { %257 = vmatpush3.bf16.xpose.msra.mxu0 %v292_v7 }
  0x34   :  { %258 = vmatprep.subr.bf16.mxu0 %v302_v0 }
  0x3b   :  { %259 = vmatpush3.bf16.xpose.msra.mxu0 %v293_v8 }
  0x42   :  { %261 = vmatmul.mubr.bf16.vlgmr.msra.gmra.mrb[0].mxu0 %v12_v9 }
 0x115   :  { %v118_v10 = vpop.f32.mrb[0].mxu0 }
 0x116   :  { %v262_v11 = vpop.f32.mrb[1].mxu0 }
 0x117   :  { %v121_v12 = vpop.f32.mrb[2].mxu0 }
 0x118   :  { %v125_v13 = vmax.f32 %v118_v10, %v121_v12  ;;  %v263_v14 = vpop.f32.mrb[3].mxu0 }
 0x11a   :  { %v126_v15 = vrot.slane %v125_v13, 4 }
 0x11c   :  { %v127_v16 = vmax.f32 %v125_v13, %v126_v15 }
 0x11e   :  { %v128_v17 = vrot.slane %v127_v16, 2 }
 0x120   :  { %v129_v18 = vmax.f32 %v127_v16, %v128_v17 }
 0x122   :  { %v130_v19 = vrot.slane %v129_v18, 1 }
 0x124   :  { %v131_v20 = vmax.f32 %v129_v18, %v130_v19 }
 0x126   :  { %v132_v21 = vsub.f32 %v118_v10, %v131_v20  ;;  %v133_v22 = vsub.f32 %v121_v12, %v131_v20 }
 0x128   :  { %v134_v23 = vmul.f32 1.442695, %v132_v21  ;;  %v136_v24 = vmul.f32 1.442695, %v133_v22 }
 0x12a   :  { %296 = vpow2.f32 %v134_v23 }
 0x12b   :  { %298 = vpow2.f32 %v136_v24 }
 0x134   :  { %v297_v25 = vpop.eup %296 }
 0x135   :  { %v299_v26 = vpop.eup %298 }
 0x136   :  { %v138_v27 = vadd.f32 %v299_v26, %v297_v25 }
 0x138   :  { %v139_v28 = vrot.slane %v138_v27, 4 }
 0x13a   :  { %v140_v29 = vadd.f32 %v139_v28, %v138_v27 }
 0x13c   :  { %v141_v30 = vrot.slane %v140_v29, 2 }
 0x13e   :  { %v142_v31 = vadd.f32 %v141_v30, %v140_v29 }
 0x140   :  { %v143_v32 = vrot.slane %v142_v31, 1 }
 0x142   :  { %v144_v33 = vadd.f32 %v143_v32, %v142_v31 }
 0x144   :  { %300 = vrcp.f32 %v144_v33 }
 0x14e   :  { %v301_v34 = vpop.eup %300 }
 0x14f   :  { %v146_v35 = vmul.f32 %v301_v34, %v297_v25  ;;  %v147_v36 = vmul.f32 %v301_v34, %v299_v26 }
 0x151   :  { %v148_v37 = vpack.c.bf16 %v147_v36, %v146_v35 }
 0x153   :  { %281 = vmatmul.mubr.bf16.vlgmr.msra.gmra.mrb[0].mxu1 %v148_v37 }
 0x226   :  { %v183_v40 = vpop.f32.mrb[0].mxu1 }
 0x227   :  { %v282_v41 = vpop.f32.mrb[1].mxu1  ;;  %v192_v43 = vmul.f32 %v190_v38, %v183_v40 }
 0x228   :  { %v186_v42 = vpop.f32.mrb[2].mxu1 }
 0x229   :  { %v193_v44 = vmul.f32 %v191_v39, %v186_v42  ;;  %v283_v45 = vpop.f32.mrb[3].mxu1 }
 0x22b   :  { %v224_v46 = vpack.c.bf16 %v193_v44, %v192_v43 }
 0x22d   :  { %225 = vst [vmem:[%s351_s2] sm:$0xff] %v224_v46  }

// kernel: gnn_layer_forward.6
= control target key start
LH: loop header
LB: loop body
LE: loop exit
PB: predicated region body
PF: predicated region fallthrough
CT: control target
= control target key end

     0   :  { %v1119_v2 = vmov 0.0   ;;  %vm1120_vm0 = vmmov 0   ;;  %s1370_s0 = inlined_call_operand.vmem [shape: bf16[16,128], index: 0, kind: input, shape index: {}]   ;;  %s1371_s1 = inlined_call_operand.vmem [shape: bf16[16,16], index: 1, kind: input, shape index: {}]   ;;  %s1372_s2 = inlined_call_operand.vmem [shape: bf16[16,128], index: 2, kind: input, shape index: {}]   ;;  %s1373_s3 = inlined_call_operand.vmem [shape: bf16[8,16], index: 3, kind: input, shape index: {}]   ;;  %s1374_s4 = inlined_call_operand.vmem [shape: bf16[8,128], index: 4, kind: input, shape index: {}]   ;;  %s1375_s5 = inlined_call_operand.vmem [shape: bf16[5,128,128], index: 5, kind: input, shape index: {}]   ;;  %s1376_s6 = inlined_call_operand.vmem [shape: f32[1,128], index: 6, kind: input, shape index: {}]   ;;  %s1377_s7 = inlined_call_operand.hbm [shape: f32[16,128], index: 7, kind: output, shape index: {}]  }
   0x1   :  { %v1047_v0 = vld [vmem:[%s1371_s1] sm:$0xff]   ;;  %929 = vmatprep.subr.bf16.mxu1 %v1119_v2  ;;  %931 = vmatprep.mubr.msk.bf16.mxu1 %vm1120_vm0, %v1119_v2  ;;  %v1051_v5 = vld [vmem:[%s1375_s5 + $0x48] sm:$0xff]   ;;  %v1053_v6 = vld [vmem:[%s1375_s5 + $0x50] sm:$0xff]  }
   0x2   :  { %v1048_v1 = vld [vmem:[%s1372_s2] sm:$0xff]   ;;  %40 = vxpose.xlu0.c.b16.start.end [1/1] (short) (narrow) %v1047_v0, 16  ;;  %941 = vmatprep.subr.bf16.mxu0 %v1119_v2  ;;  %v1055_v7 = vld [vmem:[%s1375_s5 + $0x58] sm:$0xff]   ;;  %v1059_v9 = vld [vmem:[%s1375_s5 + $0x68] sm:$0xff]  }
   0x3   :  { %v107_v3 = vld [vmem:[%s1373_s3] sm:$0xf]  ;;  %930 = vmatpush3.bf16.msra.mxu1 %v1048_v1  ;;  %957 = vmatprep.mubr.msk.bf16.mxu0 %vm1120_vm0, %v1119_v2  ;;  %v1061_v10 = vld [vmem:[%s1375_s5 + $0x70] sm:$0xff]  }
   0x4   :  { %v1049_v4 = vld [vmem:[%s1375_s5 + $0x40] sm:$0xff]   ;;  %935 = vmatprep.subr.bf16.mxu1 %v1119_v2 }
   0x5   :  { %942 = vmatpush3.bf16.msra.mxu0 %v1049_v4  ;;  %v1057_v8 = vld [vmem:[%s1375_s5 + $0x60] sm:$0xff]  }
   0x6   :  { %109 = vxpose.xlu0.c.b16.start.end [1/1] (short) (narrow) %v107_v3, 16  ;;  %943 = vmatprep.subr.bf16.mxu0 %v1119_v2 }
   0x9   :  { %944 = vmatpush3.bf16.msra.mxu0 %v1051_v5 }
   0xa   :  { %945 = vmatprep.subr.bf16.mxu0 %v1119_v2 }
   0xd   :  { %946 = vmatpush3.bf16.msra.mxu0 %v1053_v6 }
   0xe   :  { %947 = vmatprep.subr.bf16.mxu0 %v1119_v2 }
  0x11   :  { %948 = vmatpush3.bf16.msra.mxu0 %v1055_v7 }
  0x12   :  { %949 = vmatprep.subr.bf16.mxu0 %v1119_v2 }
  0x15   :  { %950 = vmatpush3.bf16.msra.mxu0 %v1057_v8 }
  0x16   :  { %951 = vmatprep.subr.bf16.mxu0 %v1119_v2 }
  0x19   :  { %952 = vmatpush3.bf16.msra.mxu0 %v1059_v9 }
  0x1a   :  { %953 = vmatprep.subr.bf16.mxu0 %v1119_v2 }
  0x1d   :  { %954 = vmatpush3.bf16.msra.mxu0 %v1061_v10 }
  0x1e   :  { %955 = vmatprep.subr.bf16.mxu0 %v1119_v2 }
  0x1f   :  { %12 = vsyncpa [#allocation3], 0  ;;  %v108_v11 = vld [vmem:[%s1374_s4] sm:$0xf]  ;;  %vm129_vm1 = vcmask 1043456   ;;  %vm62_vm2 = vcmask 130048  }
  0x20   :  { %v131_v12 = vsel %vm129_vm1, %v108_v11, 0  ;;  %vm125_vm3 = vcmask 64512   ;;  %v1050_v15 = vld [vmem:[%s1375_s5] sm:$0xff]   ;;  %v1052_v16 = vld [vmem:[%s1375_s5 + $0x8] sm:$0xff]   ;;  %v1054_v17 = vld [vmem:[%s1375_s5 + $0x10] sm:$0xff]  }
  0x21   :  { %v1056_v18 = vld [vmem:[%s1375_s5 + $0x18] sm:$0xff]   ;;  %v1058_v19 = vld [vmem:[%s1375_s5 + $0x20] sm:$0xff]   ;;  %v1060_v20 = vld [vmem:[%s1375_s5 + $0x28] sm:$0xff]  }
  0x22   :  { %v1062_v21 = vld [vmem:[%s1375_s5 + $0x30] sm:$0xff]   ;;  %v1063_v22 = vld [vmem:[%s1375_s5 + $0x78] sm:$0xff]   ;;  %v28_v24 = vld [vmem:[%s1370_s0] sm:$0xff]  }
  0x23   :  { %v1065_v23 = vld [vmem:[%s1375_s5 + $0x38] sm:$0xff]   ;;  %956 = vmatpush3.bf16.msra.mxu0 %v1063_v22  ;;  %v1067_v25 = vld [vmem:[%s1375_s5 + $0xc0] sm:$0xff]   ;;  %v1069_v26 = vld [vmem:[%s1375_s5 + $0xc8] sm:$0xff]   ;;  %v174_v33 = vunpack.c.l.bf16 %v28_v24  ;;  %v175_v34 = vunpack.c.h.bf16 %v28_v24 }
  0x24   :  { %981 = vmatprep.subr.bf16.mxu0 %v1119_v2  ;;  %v1071_v27 = vld [vmem:[%s1375_s5 + $0xd0] sm:$0xff]   ;;  %v1073_v28 = vld [vmem:[%s1375_s5 + $0xd8] sm:$0xff]   ;;  %v1075_v29 = vld [vmem:[%s1375_s5 + $0xe0] sm:$0xff]  }
  0x25   :  { %v1077_v30 = vld [vmem:[%s1375_s5 + $0xe8] sm:$0xff]   ;;  %v1079_v31 = vld [vmem:[%s1375_s5 + $0xf0] sm:$0xff]   ;;  %v1081_v32 = vld [vmem:[%s1375_s5 + $0xf8] sm:$0xff]  }
  0x26   :  { %v1066_v39 = vld [vmem:[%s1375_s5 + $0x80] sm:$0xff]   ;;  %v1068_v44 = vld [vmem:[%s1375_s5 + $0x88] sm:$0xff]   ;;  %v1070_v48 = vld [vmem:[%s1375_s5 + $0x90] sm:$0xff]  }
  0x27   :  { %v1072_v54 = vld [vmem:[%s1375_s5 + $0x98] sm:$0xff]   ;;  %v1074_v55 = vld [vmem:[%s1375_s5 + $0xa0] sm:$0xff]   ;;  %v1076_v56 = vld [vmem:[%s1375_s5 + $0xa8] sm:$0xff]  }
  0x28   :  { %v1078_v57 = vld [vmem:[%s1375_s5 + $0xb0] sm:$0xff]   ;;  %v1080_v58 = vld [vmem:[%s1375_s5 + $0xb8] sm:$0xff]   ;;  %v1082_v59 = vld [vmem:[%s1375_s5 + $0x100] sm:$0xff]  }
  0x29   :  { %v1083_v60 = vld [vmem:[%s1375_s5 + $0x108] sm:$0xff]   ;;  %v1084_v61 = vld [vmem:[%s1375_s5 + $0x110] sm:$0xff]   ;;  %v1085_v62 = vld [vmem:[%s1375_s5 + $0x118] sm:$0xff]  }
  0x2a   :  { %v1086_v63 = vld [vmem:[%s1375_s5 + $0x120] sm:$0xff]   ;;  %v1087_v0 = vld [vmem:[%s1375_s5 + $0x128] sm:$0xff]   ;;  %v1088_v1 = vld [vmem:[%s1375_s5 + $0x130] sm:$0xff]  }
  0x2b   :  { %v1089_v3 = vld [vmem:[%s1375_s5 + $0x138] sm:$0xff]  }
  0x68   :  { %v48_v13 = vpop.trf.xlu0 }
  0x69   :  { %932 = vmatmul.mubr.msk.bf16.vlgmr.msra.gmra.mrb[0].mxu1 %vm62_vm2, %v48_v13 }
  0x6a   :  { %936 = vmatpush3.bf16.msra.mxu1 %v131_v12  ;;  %937 = vmatprep.mubr.msk.bf16.mxu1 %vm1120_vm0, %v1119_v2 }
  0x6b   :  { %961 = vmatprep.subr.bf16.mxu1 %v1119_v2 }
  0x6c   :  { %v117_v14 = vpop.trf.xlu0 }
  0x71   :  { %938 = vmatmul.mubr.msk.bf16.vlgmr.msra.gmra.mrb[4].mxu1 %vm125_vm3, %v117_v14 }
  0x72   :  { %962 = vmatpush3.bf16.msra.mxu1 %v1050_v15  ;;  %977 = vmatprep.mubr.msk.bf16.mxu1 %vm1120_vm0, %v1119_v2 }
  0x73   :  { %963 = vmatprep.subr.bf16.mxu1 %v1119_v2 }
  0x76   :  { %964 = vmatpush3.bf16.msra.mxu1 %v1052_v16 }
  0x77   :  { %965 = vmatprep.subr.bf16.mxu1 %v1119_v2 }
  0x7a   :  { %966 = vmatpush3.bf16.msra.mxu1 %v1054_v17 }
  0x7b   :  { %967 = vmatprep.subr.bf16.mxu1 %v1119_v2 }
  0x7e   :  { %968 = vmatpush3.bf16.msra.mxu1 %v1056_v18 }
  0x7f   :  { %969 = vmatprep.subr.bf16.mxu1 %v1119_v2 }
  0x82   :  { %970 = vmatpush3.bf16.msra.mxu1 %v1058_v19 }
  0x83   :  { %971 = vmatprep.subr.bf16.mxu1 %v1119_v2 }
  0x86   :  { %972 = vmatpush3.bf16.msra.mxu1 %v1060_v20 }
  0x87   :  { %973 = vmatprep.subr.bf16.mxu1 %v1119_v2 }
  0x8a   :  { %974 = vmatpush3.bf16.msra.mxu1 %v1062_v21 }
  0x8b   :  { %975 = vmatprep.subr.bf16.mxu1 %v1119_v2 }
  0x8e   :  { %976 = vmatpush3.bf16.msra.mxu1 %v1065_v23 }
  0x8f   :  { %1001 = vmatprep.subr.bf16.mxu1 %v1119_v2 }
  0x91   :  { %978 = vmatmul.mubr.bf16.vlgmr.msra.gmra.mrb[8].mxu1 %v28_v24 }
  0x92   :  { %1017 = vmatprep.mubr.msk.bf16.mxu1 %vm1120_vm0, %v1119_v2  ;;  %1002 = vmatpush3.bf16.msra.mxu1 %v1067_v25 }
  0x93   :  { %1003 = vmatprep.subr.bf16.mxu1 %v1119_v2 }
  0x96   :  { %1004 = vmatpush3.bf16.msra.mxu1 %v1069_v26  ;;  %v879_v26 = vld [vmem:[%s1376_s6] ss:$0 sm:$0xff]  ;;  %s1121_s6 = smov [#allocation2]  }
  0x97   :  { %1005 = vmatprep.subr.bf16.mxu1 %v1119_v2  ;;  %s759_s1 = sshll.u32 %s1121_s6, 4  ;;  %s760_s1 = int_to_ptr.vmem [resolvable:$true] %s759_s1 }
  0x98   :  { %s1095_s2 = scalar_lea.vmem %s760_s1, 256  ;;  %p1100_p1 = scmp.lt.s32.totalorder %s760_s1, %s760_s1 }
  0x99   :  { %p1096_p0 = scmp.ne.s32.totalorder %s760_s1, %s1095_s2  ;;  %p1101_p2 = scmp.lt.s32.totalorder %s1095_s2, %s1095_s2 }
  0x9a   :  { %1006 = vmatpush3.bf16.msra.mxu1 %v1071_v27 }
  0x9b   :  { %1007 = vmatprep.subr.bf16.mxu1 %v1119_v2  ;;  %p1102_p3 = por %p1101_p2, %p1100_p1 }
  0x9d   :  { %p1103_p4 = pnand %p1102_p3, %p1096_p0 }
  0x9e   :  { %1008 = vmatpush3.bf16.msra.mxu1 %v1073_v28 }
  0x9f   :  { %1009 = vmatprep.subr.bf16.mxu1 %v1119_v2 }
  0xa2   :  { %1010 = vmatpush3.bf16.msra.mxu1 %v1075_v29 }
  0xa3   :  { %1011 = vmatprep.subr.bf16.mxu1 %v1119_v2 }
  0xa6   :  { %1012 = vmatpush3.bf16.msra.mxu1 %v1077_v30 }
  0xa7   :  { %1013 = vmatprep.subr.bf16.mxu1 %v1119_v2 }
  0xaa   :  { %1014 = vmatpush3.bf16.msra.mxu1 %v1079_v31 }
  0xab   :  { %1015 = vmatprep.subr.bf16.mxu1 %v1119_v2 }
  0xae   :  { %1016 = vmatpush3.bf16.msra.mxu1 %v1081_v32 }
 0x13c   :  { %v100_v35 = vpop.f32.mrb[0].mxu1 }
 0x13d   :  { %v176_v36 = vmul.f32 %v174_v33, %v100_v35  ;;  %v933_v37 = vpop.f32.mrb[1].mxu1 }
 0x13e   :  { %v103_v38 = vpop.f32.mrb[2].mxu1 }
 0x13f   :  { %v177_v40 = vmul.f32 %v175_v34, %v103_v38  ;;  %v196_v41 = vpack.c.bf16 %v103_v38, %v100_v35  ;;  %v934_v42 = vpop.f32.mrb[3].mxu1 }
 0x141   :  { %v398_v43 = vpack.c.bf16 %v177_v40, %v176_v36  ;;  %958 = vmatmul.mubr.bf16.vlgmr.msra.gmra.mrb[0].mxu0 %v196_v41 }
 0x142   :  { %982 = vmatpush3.bf16.msra.mxu0 %v1066_v39  ;;  %997 = vmatprep.mubr.msk.bf16.mxu0 %vm1120_vm0, %v1119_v2 }
 0x143   :  { %983 = vmatprep.subr.bf16.mxu0 %v1119_v2 }
 0x144   :  { %v167_v45 = vpop.f32.mrb[4].mxu1 }
 0x145   :  { %v178_v46 = vmul.f32 %v174_v33, %v167_v45  ;;  %v939_v47 = vpop.f32.mrb[5].mxu1 }
 0x146   :  { %984 = vmatpush3.bf16.msra.mxu0 %v1068_v44  ;;  %v170_v49 = vpop.f32.mrb[6].mxu1 }
 0x147   :  { %985 = vmatprep.subr.bf16.mxu0 %v1119_v2  ;;  %v179_v50 = vmul.f32 %v175_v34, %v170_v49  ;;  %v616_v51 = vpack.c.bf16 %v170_v49, %v167_v45  ;;  %v940_v52 = vpop.f32.mrb[7].mxu1 }
 0x149   :  { %v507_v53 = vpack.c.bf16 %v179_v50, %v178_v46 }
 0x14a   :  { %986 = vmatpush3.bf16.msra.mxu0 %v1070_v48 }
 0x14b   :  { %987 = vmatprep.subr.bf16.mxu0 %v1119_v2  ;;  %1018 = vmatmul.mubr.bf16.vlgmr.msra.gmra.mrb[12].mxu1 %v507_v53 }
 0x14e   :  { %988 = vmatpush3.bf16.msra.mxu0 %v1072_v54 }
 0x14f   :  { %989 = vmatprep.subr.bf16.mxu0 %v1119_v2 }
 0x152   :  { %990 = vmatpush3.bf16.msra.mxu0 %v1074_v55 }
 0x153   :  { %991 = vmatprep.subr.bf16.mxu0 %v1119_v2 }
 0x156   :  { %992 = vmatpush3.bf16.msra.mxu0 %v1076_v56 }
 0x157   :  { %993 = vmatprep.subr.bf16.mxu0 %v1119_v2 }
 0x15a   :  { %994 = vmatpush3.bf16.msra.mxu0 %v1078_v57 }
 0x15b   :  { %995 = vmatprep.subr.bf16.mxu0 %v1119_v2 }
 0x15e   :  { %996 = vmatpush3.bf16.msra.mxu0 %v1080_v58 }
 0x15f   :  { %1021 = vmatprep.subr.bf16.mxu0 %v1119_v2 }
 0x161   :  { %998 = vmatmul.mubr.bf16.vlgmr.msra.gmra.mrb[4].mxu0 %v398_v43 }
 0x162   :  { %1022 = vmatpush3.bf16.msra.mxu0 %v1082_v59  ;;  %1037 = vmatprep.mubr.msk.bf16.mxu0 %vm1120_vm0, %v1119_v2 }
 0x163   :  { %1023 = vmatprep.subr.bf16.mxu0 %v1119_v2 }
 0x164   :  { %v391_v4 = vpop.f32.mrb[8].mxu1 }
 0x165   :  { %v979_v5 = vpop.f32.mrb[9].mxu1 }
 0x166   :  { %1024 = vmatpush3.bf16.msra.mxu0 %v1083_v60  ;;  %v394_v6 = vpop.f32.mrb[10].mxu1 }
 0x167   :  { %1025 = vmatprep.subr.bf16.mxu0 %v1119_v2  ;;  %v980_v7 = vpop.f32.mrb[11].mxu1 }
 0x16a   :  { %1026 = vmatpush3.bf16.msra.mxu0 %v1084_v61 }
 0x16b   :  { %1027 = vmatprep.subr.bf16.mxu0 %v1119_v2 }
 0x16e   :  { %1028 = vmatpush3.bf16.msra.mxu0 %v1085_v62 }
 0x16f   :  { %1029 = vmatprep.subr.bf16.mxu0 %v1119_v2 }
 0x172   :  { %1030 = vmatpush3.bf16.msra.mxu0 %v1086_v63 }
 0x173   :  { %1031 = vmatprep.subr.bf16.mxu0 %v1119_v2 }
 0x176   :  { %1032 = vmatpush3.bf16.msra.mxu0 %v1087_v0 }
 0x177   :  { %1033 = vmatprep.subr.bf16.mxu0 %v1119_v2 }
 0x17a   :  { %1034 = vmatpush3.bf16.msra.mxu0 %v1088_v1 }
 0x17b   :  { %1035 = vmatprep.subr.bf16.mxu0 %v1119_v2 }
 0x17e   :  { %1036 = vmatpush3.bf16.msra.mxu0 %v1089_v3 }
 0x181   :  { %1038 = vmatmul.mubr.bf16.vlgmr.msra.gmra.mrb[8].mxu0 %v616_v51 }
 0x214   :  { %v296_v8 = vpop.f32.mrb[0].mxu0 }
 0x215   :  { %v392_v9 = vadd.f32 %v391_v4, %v296_v8  ;;  %v959_v10 = vpop.f32.mrb[1].mxu0 }
 0x216   :  { %v299_v11 = vpop.f32.mrb[2].mxu0 }
 0x217   :  { %v395_v12 = vadd.f32 %v394_v6, %v299_v11  ;;  %v960_v13 = vpop.f32.mrb[3].mxu0 }
 0x21e   :  { %v607_v14 = vpop.f32.mrb[12].mxu1 }
 0x21f   :  { %v1019_v15 = vpop.f32.mrb[13].mxu1 }
 0x220   :  { %v610_v16 = vpop.f32.mrb[14].mxu1 }
 0x221   :  { %v1020_v17 = vpop.f32.mrb[15].mxu1 }
 0x234   :  { %v498_v18 = vpop.f32.mrb[4].mxu0 }
 0x235   :  { %v505_v19 = vadd.f32 %v498_v18, %v392_v9  ;;  %v999_v20 = vpop.f32.mrb[5].mxu0 }
 0x236   :  { %v501_v2 = vpop.f32.mrb[6].mxu0 }
 0x237   :  { %v506_v21 = vadd.f32 %v501_v2, %v395_v12  ;;  %v614_v22 = vadd.f32 %v607_v14, %v505_v19  ;;  %v1000_v23 = vpop.f32.mrb[7].mxu0 }
 0x239   :  { %v615_v24 = vadd.f32 %v610_v16, %v506_v21 }
 0x254   :  { %v716_v25 = vpop.f32.mrb[8].mxu0 }
 0x255   :  { %v723_v27 = vadd.f32 %v716_v25, %v614_v22  ;;  %v1039_v28 = vpop.f32.mrb[9].mxu0 }
 0x256   :  { %v719_v29 = vpop.f32.mrb[10].mxu0 }
 0x257   :  { %v732_v30 = vadd.f32 %v879_v26, %v723_v27  ;;  %v724_v31 = vadd.f32 %v719_v29, %v615_v24  ;;  %v1040_v32 = vpop.f32.mrb[11].mxu0 }
 0x259   :  { %v733_v33 = vadd.f32 %v879_v26, %v724_v31  ;;  %vm734_vm4 = vcmp.ge.f32.partialorder %v732_v30, 0.0  ;;  %v736_v34 = vmul.f32 0.01, %v732_v30 }
 0x25b   :  { %v738_v35 = vsel %vm734_vm4, %v732_v30, %v736_v34  ;;  %vm735_vm5 = vcmp.ge.f32.partialorder %v733_v33, 0.0  ;;  %v737_v36 = vmul.f32 0.01, %v733_v33 }
 0x25c   :  { %v740_v37 = vmul.f32 %v738_v35, %v738_v35 }
 0x25d   :  { %v739_v38 = vsel %vm735_vm5, %v733_v33, %v737_v36 }
 0x25e   :  { %742 = vadd.xlane.f32.xlu1 %v740_v37  ;;  %v741_v39 = vmul.f32 %v739_v38, %v739_v38 }
 0x262   :  { %744 = vadd.xlane.f32.xlu1 %v741_v39 }
 0x2eb   :  { %v743_v40 = vpop.xlane.xlu1 %742 }
 0x2ec   :  { %v746_v41 = vmax.f32 %v743_v40, 1e-24 }
 0x2ee   :  { %1091 = vrsqrt.f32 %v746_v41 }
 0x2ef   :  { %v745_v42 = vpop.xlane.xlu1 %744 }
 0x2f0   :  { %v747_v43 = vmax.f32 %v745_v42, 1e-24 }
 0x2f2   :  { %1093 = vrsqrt.f32 %v747_v43 }
 0x2f8   :  { %v1092_v44 = vpop.eup %1091 }
 0x2f9   :  { %v750_v45 = vmul.f32 %v1092_v44, %v738_v35 }
 0x2fb   :  { %752 = vst [vmem:[#allocation2] sm:$0xff] %v750_v45 }
 0x2fc   :  { %v1094_v46 = vpop.eup %1093 }
 0x2fd   :  { %v751_v47 = vmul.f32 %v1094_v46, %v739_v38 }
 0x2ff   :  { %753 = vst [vmem:[#allocation2 + $0x8] sm:$0xff] %v751_v47 }
 0x300   :  { %1106 = shalt.err (!%p1103_p4)
}
 0x301   :  { %s1107_s10 = scalar_lea.hbm %s1377_s7, 256 }
 0x302   :  { %p1108_p5 = scmp.ne.s32.totalorder %s1377_s7, %s1107_s10  ;;  %p1111_p6 = scmp.lt.u32.totalorder %s1107_s10, %s1377_s7 }
 0x304   :  { %p1113_p7 = pnand %p1111_p6, %p1108_p5 }
 0x306   :  { %1116 = shalt.err (!%p1113_p7)
}
 0x307   :  { %s1122_s15 = smov 128   ;;  %s1123_s16 = smov 8  }
 0x308   :  { %765 = dma.vmem_to_hbm [thread:$0]  %s760_s1, 256, %s1377_s7, [#allocation3], %s1122_s15, %s1122_s15, %s1123_s16  }
 0x309   :  { %1117 = dma.done.wait [#allocation3], 256  }
 0x30a   :  { %1118 = vsyncadd [#allocation3], 4294967040 }
 0x30b   :  { %769 = vsyncpa [#allocation3], 1 }

// kernel: gnn_layer_forward.5
= control target key start
LH: loop header
LB: loop body
LE: loop exit
PB: predicated region body
PF: predicated region fallthrough
CT: control target
= control target key end

     0   :  { %v1102_v2 = vmov 0.0   ;;  %vm1103_vm0 = vmmov 0   ;;  %vm45_vm1 = vcmask 130048   ;;  %vm112_vm2 = vcmask 1043456   ;;  %s1366_s0 = inlined_call_operand.vmem [shape: bf16[16,128], index: 0, kind: input, shape index: {}]   ;;  %s1367_s1 = inlined_call_operand.vmem [shape: bf16[16,16], index: 1, kind: input, shape index: {}]   ;;  %s1368_s2 = inlined_call_operand.vmem [shape: bf16[16,128], index: 2, kind: input, shape index: {}]   ;;  %s1369_s3 = inlined_call_operand.vmem [shape: bf16[8,16], index: 3, kind: input, shape index: {}]   ;;  %s1370_s4 = inlined_call_operand.vmem [shape: bf16[8,128], index: 4, kind: input, shape index: {}]   ;;  %s1371_s5 = inlined_call_operand.vmem [shape: bf16[5,128,128], index: 5, kind: input, shape index: {}]   ;;  %s1372_s6 = inlined_call_operand.vmem [shape: f32[1,128], index: 6, kind: input, shape index: {}]   ;;  %s1373_s7 = inlined_call_operand.hbm [shape: f32[16,128], index: 7, kind: output, shape index: {}]  }
   0x1   :  { %v90_v0 = vld [vmem:[%s1369_s3] sm:$0xf]  ;;  %912 = vmatprep.subr.bf16.mxu1 %v1102_v2  ;;  %914 = vmatprep.mubr.msk.bf16.mxu1 %vm1103_vm0, %v1102_v2  ;;  %v1033_v7 = vld [vmem:[%s1371_s5 + $0x48] sm:$0xff]   ;;  %v1034_v8 = vld [vmem:[%s1371_s5 + $0x50] sm:$0xff]  }
   0x2   :  { %v1030_v1 = vld [vmem:[%s1368_s2] sm:$0xff]   ;;  %92 = vxpose.xlu0.c.b16.start.end [1/1] (short) (narrow) %v90_v0, 16  ;;  %924 = vmatprep.subr.bf16.mxu0 %v1102_v2  ;;  %v1035_v9 = vld [vmem:[%s1371_s5 + $0x58] sm:$0xff]   ;;  %v1037_v11 = vld [vmem:[%s1371_s5 + $0x68] sm:$0xff]  }
   0x3   :  { %913 = vmatpush3.bf16.msra.mxu1 %v1030_v1  ;;  %v1031_v3 = vld [vmem:[%s1367_s1] sm:$0xff]   ;;  %940 = vmatprep.mubr.msk.bf16.mxu0 %vm1103_vm0, %v1102_v2  ;;  %v1038_v12 = vld [vmem:[%s1371_s5 + $0x70] sm:$0xff]  }
   0x4   :  { %918 = vmatprep.subr.bf16.mxu1 %v1102_v2  ;;  %v91_v4 = vld [vmem:[%s1370_s4] sm:$0xf] }
   0x5   :  { %v1032_v5 = vld [vmem:[%s1371_s5 + $0x40] sm:$0xff]   ;;  %v114_v6 = vsel %vm112_vm2, %v91_v4, 0 }
   0x6   :  { %915 = vmatmul.mubr.msk.bf16.vlgmr.msra.gmra.mrb[0].mxu1 %vm45_vm1, %v1031_v3  ;;  %925 = vmatpush3.bf16.msra.mxu0 %v1032_v5  ;;  %v1036_v10 = vld [vmem:[%s1371_s5 + $0x60] sm:$0xff]  }
   0x7   :  { %919 = vmatpush3.bf16.msra.mxu1 %v114_v6  ;;  %920 = vmatprep.mubr.msk.bf16.mxu1 %vm1103_vm0, %v1102_v2 }
   0x8   :  { %926 = vmatprep.subr.bf16.mxu0 %v1102_v2  ;;  %944 = vmatprep.subr.bf16.mxu1 %v1102_v2 }
   0xa   :  { %927 = vmatpush3.bf16.msra.mxu0 %v1033_v7 }
   0xb   :  { %928 = vmatprep.subr.bf16.mxu0 %v1102_v2 }
   0xe   :  { %929 = vmatpush3.bf16.msra.mxu0 %v1034_v8 }
   0xf   :  { %930 = vmatprep.subr.bf16.mxu0 %v1102_v2 }
  0x12   :  { %931 = vmatpush3.bf16.msra.mxu0 %v1035_v9 }
  0x13   :  { %932 = vmatprep.subr.bf16.mxu0 %v1102_v2 }
  0x16   :  { %933 = vmatpush3.bf16.msra.mxu0 %v1036_v10 }
  0x17   :  { %934 = vmatprep.subr.bf16.mxu0 %v1102_v2 }
  0x1a   :  { %935 = vmatpush3.bf16.msra.mxu0 %v1037_v11 }
  0x1b   :  { %936 = vmatprep.subr.bf16.mxu0 %v1102_v2 }
  0x1e   :  { %937 = vmatpush3.bf16.msra.mxu0 %v1038_v12 }
  0x1f   :  { %938 = vmatprep.subr.bf16.mxu0 %v1102_v2 }
  0x20   :  { %12 = vsyncpa [#allocation3], 0  ;;  %v1039_v13 = vld [vmem:[%s1371_s5 + $0x78] sm:$0xff]   ;;  %vm108_vm3 = vcmask 64512   ;;  %v1041_v14 = vld [vmem:[%s1371_s5] sm:$0xff]  }
  0x21   :  { %v1043_v16 = vld [vmem:[%s1371_s5 + $0x8] sm:$0xff]   ;;  %v1045_v17 = vld [vmem:[%s1371_s5 + $0x10] sm:$0xff]   ;;  %v1047_v18 = vld [vmem:[%s1371_s5 + $0x18] sm:$0xff]  }
  0x22   :  { %939 = vmatpush3.bf16.msra.mxu0 %v1039_v13  ;;  %v1049_v19 = vld [vmem:[%s1371_s5 + $0x20] sm:$0xff]   ;;  %v1051_v20 = vld [vmem:[%s1371_s5 + $0x28] sm:$0xff]   ;;  %v1053_v21 = vld [vmem:[%s1371_s5 + $0x30] sm:$0xff]  }
  0x23   :  { %964 = vmatprep.subr.bf16.mxu0 %v1102_v2  ;;  %v1055_v22 = vld [vmem:[%s1371_s5 + $0x38] sm:$0xff]   ;;  %v1237_v23 = vld [vmem:[%s1366_s0] sm:$0xff]   ;;  %v1060_v25 = vld [vmem:[%s1371_s5 + $0xc8] sm:$0xff]  }
  0x24   :  { %v1058_v24 = vld [vmem:[%s1371_s5 + $0xc0] sm:$0xff]   ;;  %v1062_v26 = vld [vmem:[%s1371_s5 + $0xd0] sm:$0xff]   ;;  %v1064_v27 = vld [vmem:[%s1371_s5 + $0xd8] sm:$0xff]   ;;  %v157_v32 = vunpack.c.l.bf16 %v1237_v23  ;;  %v158_v33 = vunpack.c.h.bf16 %v1237_v23 }
  0x25   :  { %v1066_v28 = vld [vmem:[%s1371_s5 + $0xe0] sm:$0xff]   ;;  %v1068_v29 = vld [vmem:[%s1371_s5 + $0xe8] sm:$0xff]   ;;  %v1070_v30 = vld [vmem:[%s1371_s5 + $0xf0] sm:$0xff]  }
  0x26   :  { %v1072_v31 = vld [vmem:[%s1371_s5 + $0xf8] sm:$0xff]   ;;  %v1042_v38 = vld [vmem:[%s1371_s5 + $0x80] sm:$0xff]   ;;  %v1044_v43 = vld [vmem:[%s1371_s5 + $0x88] sm:$0xff]  }
  0x27   :  { %v1046_v44 = vld [vmem:[%s1371_s5 + $0x90] sm:$0xff]   ;;  %v1048_v45 = vld [vmem:[%s1371_s5 + $0x98] sm:$0xff]   ;;  %v1050_v46 = vld [vmem:[%s1371_s5 + $0xa0] sm:$0xff]  }
  0x28   :  { %v1052_v47 = vld [vmem:[%s1371_s5 + $0xa8] sm:$0xff]   ;;  %v1054_v48 = vld [vmem:[%s1371_s5 + $0xb0] sm:$0xff]   ;;  %v1056_v49 = vld [vmem:[%s1371_s5 + $0xb8] sm:$0xff]  }
  0x29   :  { %v1057_v50 = vld [vmem:[%s1371_s5 + $0x100] sm:$0xff]   ;;  %v1059_v51 = vld [vmem:[%s1371_s5 + $0x108] sm:$0xff]   ;;  %v1061_v52 = vld [vmem:[%s1371_s5 + $0x110] sm:$0xff]  }
  0x2a   :  { %v1063_v53 = vld [vmem:[%s1371_s5 + $0x118] sm:$0xff]   ;;  %v1065_v54 = vld [vmem:[%s1371_s5 + $0x120] sm:$0xff]   ;;  %v1067_v55 = vld [vmem:[%s1371_s5 + $0x128] sm:$0xff]  }
  0x2b   :  { %v1069_v56 = vld [vmem:[%s1371_s5 + $0x130] sm:$0xff]   ;;  %v1071_v57 = vld [vmem:[%s1371_s5 + $0x138] sm:$0xff]  }
  0x68   :  { %v100_v15 = vpop.trf.xlu0 }
  0x69   :  { %921 = vmatmul.mubr.msk.bf16.vlgmr.msra.gmra.mrb[4].mxu1 %vm108_vm3, %v100_v15 }
  0x6a   :  { %945 = vmatpush3.bf16.msra.mxu1 %v1041_v14  ;;  %960 = vmatprep.mubr.msk.bf16.mxu1 %vm1103_vm0, %v1102_v2 }
  0x6b   :  { %946 = vmatprep.subr.bf16.mxu1 %v1102_v2 }
  0x6e   :  { %947 = vmatpush3.bf16.msra.mxu1 %v1043_v16 }
  0x6f   :  { %948 = vmatprep.subr.bf16.mxu1 %v1102_v2 }
  0x72   :  { %949 = vmatpush3.bf16.msra.mxu1 %v1045_v17 }
  0x73   :  { %950 = vmatprep.subr.bf16.mxu1 %v1102_v2 }
  0x76   :  { %951 = vmatpush3.bf16.msra.mxu1 %v1047_v18 }
  0x77   :  { %952 = vmatprep.subr.bf16.mxu1 %v1102_v2 }
  0x7a   :  { %953 = vmatpush3.bf16.msra.mxu1 %v1049_v19 }
  0x7b   :  { %954 = vmatprep.subr.bf16.mxu1 %v1102_v2 }
  0x7e   :  { %955 = vmatpush3.bf16.msra.mxu1 %v1051_v20 }
  0x7f   :  { %956 = vmatprep.subr.bf16.mxu1 %v1102_v2 }
  0x82   :  { %957 = vmatpush3.bf16.msra.mxu1 %v1053_v21 }
  0x83   :  { %958 = vmatprep.subr.bf16.mxu1 %v1102_v2 }
  0x86   :  { %959 = vmatpush3.bf16.msra.mxu1 %v1055_v22 }
  0x87   :  { %984 = vmatprep.subr.bf16.mxu1 %v1102_v2 }
  0x89   :  { %961 = vmatmul.mubr.bf16.vlgmr.msra.gmra.mrb[8].mxu1 %v1237_v23 }
  0x8a   :  { %985 = vmatpush3.bf16.msra.mxu1 %v1058_v24  ;;  %1000 = vmatprep.mubr.msk.bf16.mxu1 %vm1103_vm0, %v1102_v2 }
  0x8b   :  { %986 = vmatprep.subr.bf16.mxu1 %v1102_v2 }
  0x8e   :  { %987 = vmatpush3.bf16.msra.mxu1 %v1060_v25  ;;  %v862_v25 = vld [vmem:[%s1372_s6] ss:$0 sm:$0xff]  ;;  %s1104_s6 = smov [#allocation2]  }
  0x8f   :  { %988 = vmatprep.subr.bf16.mxu1 %v1102_v2  ;;  %s742_s2 = sshll.u32 %s1104_s6, 4  ;;  %s743_s2 = int_to_ptr.vmem [resolvable:$true] %s742_s2 }
  0x90   :  { %s1078_s8 = scalar_lea.vmem %s743_s2, 256  ;;  %p1083_p1 = scmp.lt.s32.totalorder %s743_s2, %s743_s2 }
  0x91   :  { %p1079_p0 = scmp.ne.s32.totalorder %s743_s2, %s1078_s8  ;;  %p1084_p2 = scmp.lt.s32.totalorder %s1078_s8, %s1078_s8 }
  0x92   :  { %989 = vmatpush3.bf16.msra.mxu1 %v1062_v26 }
  0x93   :  { %990 = vmatprep.subr.bf16.mxu1 %v1102_v2  ;;  %p1085_p3 = por %p1084_p2, %p1083_p1 }
  0x95   :  { %p1086_p4 = pnand %p1085_p3, %p1079_p0 }
  0x96   :  { %991 = vmatpush3.bf16.msra.mxu1 %v1064_v27 }
  0x97   :  { %992 = vmatprep.subr.bf16.mxu1 %v1102_v2 }
  0x9a   :  { %993 = vmatpush3.bf16.msra.mxu1 %v1066_v28 }
  0x9b   :  { %994 = vmatprep.subr.bf16.mxu1 %v1102_v2 }
  0x9e   :  { %995 = vmatpush3.bf16.msra.mxu1 %v1068_v29 }
  0x9f   :  { %996 = vmatprep.subr.bf16.mxu1 %v1102_v2 }
  0xa2   :  { %997 = vmatpush3.bf16.msra.mxu1 %v1070_v30 }
  0xa3   :  { %998 = vmatprep.subr.bf16.mxu1 %v1102_v2 }
  0xa6   :  { %999 = vmatpush3.bf16.msra.mxu1 %v1072_v31 }
  0xd9   :  { %v83_v34 = vpop.f32.mrb[0].mxu1 }
  0xda   :  { %v159_v35 = vmul.f32 %v157_v32, %v83_v34  ;;  %v916_v36 = vpop.f32.mrb[1].mxu1 }
  0xdb   :  { %v86_v37 = vpop.f32.mrb[2].mxu1 }
  0xdc   :  { %v160_v39 = vmul.f32 %v158_v33, %v86_v37  ;;  %v179_v40 = vpack.c.bf16 %v86_v37, %v83_v34  ;;  %v917_v41 = vpop.f32.mrb[3].mxu1 }
  0xde   :  { %v381_v42 = vpack.c.bf16 %v160_v39, %v159_v35  ;;  %941 = vmatmul.mubr.bf16.vlgmr.msra.gmra.mrb[0].mxu0 %v179_v40 }
  0xdf   :  { %965 = vmatpush3.bf16.msra.mxu0 %v1042_v38  ;;  %980 = vmatprep.mubr.msk.bf16.mxu0 %vm1103_vm0, %v1102_v2 }
  0xe0   :  { %966 = vmatprep.subr.bf16.mxu0 %v1102_v2 }
  0xe3   :  { %967 = vmatpush3.bf16.msra.mxu0 %v1044_v43 }
  0xe4   :  { %968 = vmatprep.subr.bf16.mxu0 %v1102_v2 }
  0xe7   :  { %969 = vmatpush3.bf16.msra.mxu0 %v1046_v44 }
  0xe8   :  { %970 = vmatprep.subr.bf16.mxu0 %v1102_v2 }
  0xeb   :  { %971 = vmatpush3.bf16.msra.mxu0 %v1048_v45 }
  0xec   :  { %972 = vmatprep.subr.bf16.mxu0 %v1102_v2 }
  0xef   :  { %973 = vmatpush3.bf16.msra.mxu0 %v1050_v46 }
  0xf0   :  { %974 = vmatprep.subr.bf16.mxu0 %v1102_v2 }
  0xf3   :  { %975 = vmatpush3.bf16.msra.mxu0 %v1052_v47 }
  0xf4   :  { %976 = vmatprep.subr.bf16.mxu0 %v1102_v2 }
  0xf7   :  { %977 = vmatpush3.bf16.msra.mxu0 %v1054_v48 }
  0xf8   :  { %978 = vmatprep.subr.bf16.mxu0 %v1102_v2 }
  0xfb   :  { %979 = vmatpush3.bf16.msra.mxu0 %v1056_v49 }
  0xfc   :  { %1004 = vmatprep.subr.bf16.mxu0 %v1102_v2 }
  0xfe   :  { %981 = vmatmul.mubr.bf16.vlgmr.msra.gmra.mrb[4].mxu0 %v381_v42 }
  0xff   :  { %1005 = vmatpush3.bf16.msra.mxu0 %v1057_v50  ;;  %1020 = vmatprep.mubr.msk.bf16.mxu0 %vm1103_vm0, %v1102_v2 }
 0x100   :  { %1006 = vmatprep.subr.bf16.mxu0 %v1102_v2 }
 0x103   :  { %1007 = vmatpush3.bf16.msra.mxu0 %v1059_v51 }
 0x104   :  { %1008 = vmatprep.subr.bf16.mxu0 %v1102_v2 }
 0x107   :  { %1009 = vmatpush3.bf16.msra.mxu0 %v1061_v52 }
 0x108   :  { %1010 = vmatprep.subr.bf16.mxu0 %v1102_v2 }
 0x10b   :  { %1011 = vmatpush3.bf16.msra.mxu0 %v1063_v53 }
 0x10c   :  { %1012 = vmatprep.subr.bf16.mxu0 %v1102_v2 }
 0x10f   :  { %1013 = vmatpush3.bf16.msra.mxu0 %v1065_v54 }
 0x110   :  { %1014 = vmatprep.subr.bf16.mxu0 %v1102_v2 }
 0x113   :  { %1015 = vmatpush3.bf16.msra.mxu0 %v1067_v55 }
 0x114   :  { %1016 = vmatprep.subr.bf16.mxu0 %v1102_v2 }
 0x117   :  { %1017 = vmatpush3.bf16.msra.mxu0 %v1069_v56 }
 0x118   :  { %1018 = vmatprep.subr.bf16.mxu0 %v1102_v2 }
 0x11b   :  { %1019 = vmatpush3.bf16.msra.mxu0 %v1071_v57 }
 0x13c   :  { %v150_v58 = vpop.f32.mrb[4].mxu1 }
 0x13d   :  { %v922_v59 = vpop.f32.mrb[5].mxu1  ;;  %v161_v61 = vmul.f32 %v157_v32, %v150_v58 }
 0x13e   :  { %v153_v60 = vpop.f32.mrb[6].mxu1 }
 0x13f   :  { %v162_v62 = vmul.f32 %v158_v33, %v153_v60  ;;  %v599_v63 = vpack.c.bf16 %v153_v60, %v150_v58  ;;  %v923_v0 = vpop.f32.mrb[7].mxu1 }
 0x141   :  { %v490_v1 = vpack.c.bf16 %v162_v62, %v161_v61  ;;  %1021 = vmatmul.mubr.bf16.vlgmr.msra.gmra.mrb[8].mxu0 %v599_v63 }
 0x143   :  { %1001 = vmatmul.mubr.bf16.vlgmr.msra.gmra.mrb[12].mxu1 %v490_v1 }
 0x15c   :  { %v374_v3 = vpop.f32.mrb[8].mxu1 }
 0x15d   :  { %v962_v4 = vpop.f32.mrb[9].mxu1 }
 0x15e   :  { %v377_v5 = vpop.f32.mrb[10].mxu1 }
 0x15f   :  { %v963_v6 = vpop.f32.mrb[11].mxu1 }
 0x1b1   :  { %v279_v2 = vpop.f32.mrb[0].mxu0 }
 0x1b2   :  { %v942_v7 = vpop.f32.mrb[1].mxu0  ;;  %v375_v8 = vadd.f32 %v374_v3, %v279_v2 }
 0x1b3   :  { %v282_v9 = vpop.f32.mrb[2].mxu0 }
 0x1b4   :  { %v943_v10 = vpop.f32.mrb[3].mxu0  ;;  %v378_v11 = vadd.f32 %v377_v5, %v282_v9 }
 0x1d1   :  { %v481_v12 = vpop.f32.mrb[4].mxu0 }
 0x1d2   :  { %v488_v13 = vadd.f32 %v481_v12, %v375_v8  ;;  %v982_v14 = vpop.f32.mrb[5].mxu0 }
 0x1d3   :  { %v484_v15 = vpop.f32.mrb[6].mxu0 }
 0x1d4   :  { %v489_v16 = vadd.f32 %v484_v15, %v378_v11  ;;  %v983_v17 = vpop.f32.mrb[7].mxu0 }
 0x214   :  { %v699_v18 = vpop.f32.mrb[8].mxu0 }
 0x215   :  { %v1022_v19 = vpop.f32.mrb[9].mxu0 }
 0x216   :  { %v590_v20 = vpop.f32.mrb[12].mxu1  ;;  %v702_v21 = vpop.f32.mrb[10].mxu0 }
 0x217   :  { %v597_v22 = vadd.f32 %v590_v20, %v488_v13  ;;  %v1002_v23 = vpop.f32.mrb[13].mxu1  ;;  %v1023_v24 = vpop.f32.mrb[11].mxu0 }
 0x218   :  { %v593_v26 = vpop.f32.mrb[14].mxu1 }
 0x219   :  { %v706_v27 = vadd.f32 %v699_v18, %v597_v22  ;;  %v598_v28 = vadd.f32 %v593_v26, %v489_v16  ;;  %v1003_v29 = vpop.f32.mrb[15].mxu1 }
 0x21b   :  { %v715_v30 = vadd.f32 %v862_v25, %v706_v27  ;;  %v707_v31 = vadd.f32 %v702_v21, %v598_v28 }
 0x21d   :  { %v716_v32 = vadd.f32 %v862_v25, %v707_v31  ;;  %vm717_vm4 = vcmp.ge.f32.partialorder %v715_v30, 0.0  ;;  %v719_v33 = vmul.f32 0.01, %v715_v30 }
 0x21f   :  { %v721_v34 = vsel %vm717_vm4, %v715_v30, %v719_v33  ;;  %vm718_vm5 = vcmp.ge.f32.partialorder %v716_v32, 0.0  ;;  %v720_v35 = vmul.f32 0.01, %v716_v32 }
 0x220   :  { %v723_v36 = vmul.f32 %v721_v34, %v721_v34 }
 0x221   :  { %v722_v37 = vsel %vm718_vm5, %v716_v32, %v720_v35 }
 0x222   :  { %725 = vadd.xlane.f32.xlu0 %v723_v36  ;;  %v724_v38 = vmul.f32 %v722_v37, %v722_v37 }
 0x224   :  { %727 = vadd.xlane.f32.xlu1 %v724_v38 }
 0x2af   :  { %v726_v39 = vpop.xlane.xlu0 %725 }
 0x2b0   :  { %v729_v40 = vmax.f32 %v726_v39, 1e-24 }
 0x2b1   :  { %v728_v41 = vpop.xlane.xlu1 %727 }
 0x2b2   :  { %1074 = vrsqrt.f32 %v729_v40  ;;  %v730_v42 = vmax.f32 %v728_v41, 1e-24 }
 0x2b4   :  { %1076 = vrsqrt.f32 %v730_v42 }
 0x2bc   :  { %v1075_v43 = vpop.eup %1074 }
 0x2bd   :  { %v733_v44 = vmul.f32 %v1075_v43, %v721_v34 }
 0x2be   :  { %v1077_v45 = vpop.eup %1076 }
 0x2bf   :  { %v734_v46 = vmul.f32 %v1077_v45, %v722_v37  ;;  %735 = vst [vmem:[#allocation2] sm:$0xff] %v733_v44 }
 0x2c1   :  { %736 = vst [vmem:[#allocation2 + $0x8] sm:$0xff] %v734_v46 }
 0x2c2   :  { %1089 = shalt.err (!%p1086_p4)
}
 0x2c3   :  { %s1090_s1 = scalar_lea.hbm %s1373_s7, 256 }
 0x2c4   :  { %p1091_p5 = scmp.ne.s32.totalorder %s1373_s7, %s1090_s1  ;;  %p1094_p6 = scmp.lt.u32.totalorder %s1090_s1, %s1373_s7 }
 0x2c6   :  { %p1096_p7 = pnand %p1094_p6, %p1091_p5 }
 0x2c8   :  { %1099 = shalt.err (!%p1096_p7)
}
 0x2c9   :  { %s1105_s14 = smov 128   ;;  %s1106_s15 = smov 8  }
 0x2ca   :  { %748 = dma.vmem_to_hbm [thread:$0]  %s743_s2, 256, %s1373_s7, [#allocation3], %s1105_s14, %s1105_s14, %s1106_s15  }
 0x2cb   :  { %1100 = dma.done.wait [#allocation3], 256  }
 0x2cc   :  { %1101 = vsyncadd [#allocation3], 4294967040 }
 0x2cd   :  { %752 = vsyncpa [#allocation3], 1 }

// kernel: gnn_layer_forward.7
= control target key start
LH: loop header
LB: loop body
LE: loop exit
PB: predicated region body
PF: predicated region fallthrough
CT: control target
= control target key end

     0   :  { %v1103_v1 = vmov 0.0   ;;  %vm1104_vm0 = vmmov 0   ;;  %vm41_vm1 = vcmask 130048   ;;  %s1366_s0 = inlined_call_operand.vmem [shape: bf16[8,128], index: 0, kind: input, shape index: {}]   ;;  %s1367_s1 = inlined_call_operand.vmem [shape: bf16[8,16], index: 1, kind: input, shape index: {}]   ;;  %s1368_s2 = inlined_call_operand.vmem [shape: bf16[16,128], index: 2, kind: input, shape index: {}]   ;;  %s1369_s3 = inlined_call_operand.vmem [shape: bf16[8,16], index: 3, kind: input, shape index: {}]   ;;  %s1370_s4 = inlined_call_operand.vmem [shape: bf16[16,128], index: 4, kind: input, shape index: {}]   ;;  %s1371_s5 = inlined_call_operand.vmem [shape: bf16[16,128], index: 5, kind: input, shape index: {}]   ;;  %s1372_s6 = inlined_call_operand.vmem [shape: bf16[5,128,128], index: 6, kind: input, shape index: {}]   ;;  %s1373_s7 = inlined_call_operand.vmem [shape: f32[1,128], index: 7, kind: input, shape index: {}]   ;;  %s1374_s8 = inlined_call_operand.hbm [shape: f32[8,128], index: 8, kind: output, shape index: {}]  }
   0x1   :  { %v1034_v0 = vld [vmem:[%s1368_s2] sm:$0xff]   ;;  %913 = vmatprep.subr.bf16.mxu0 %v1103_v1  ;;  %931 = vmatprep.subr.bf16.mxu1 %v1103_v1  ;;  %v1047_v7 = vld [vmem:[%s1372_s6 + $0x48] sm:$0xff]   ;;  %v1049_v9 = vld [vmem:[%s1372_s6 + $0x50] sm:$0xff]  }
   0x2   :  { %914 = vmatpush3.bf16.msra.mxu0 %v1034_v0  ;;  %915 = vmatprep.mubr.msk.bf16.mxu0 %vm1104_vm0, %v1103_v1  ;;  %v32_v2 = vld [vmem:[%s1367_s1] sm:$0xf]  ;;  %v1038_v10 = vld [vmem:[%s1372_s6 + $0x8] sm:$0xff]   ;;  %v1051_v11 = vld [vmem:[%s1372_s6 + $0x58] sm:$0xff]  }
   0x3   :  { %v1035_v3 = vld [vmem:[%s1370_s4] sm:$0xff]   ;;  %919 = vmatprep.subr.bf16.mxu0 %v1103_v1  ;;  %947 = vmatprep.mubr.msk.bf16.mxu1 %vm1104_vm0, %v1103_v1  ;;  %v1039_v12 = vld [vmem:[%s1372_s6 + $0x10] sm:$0xff]   ;;  %v1040_v14 = vld [vmem:[%s1372_s6 + $0x18] sm:$0xff]  }
   0x4   :  { %v85_v4 = vld [vmem:[%s1369_s3] sm:$0xf]  ;;  %v1055_v15 = vld [vmem:[%s1372_s6 + $0x68] sm:$0xff]   ;;  %v1057_v17 = vld [vmem:[%s1372_s6 + $0x70] sm:$0xff]  }
   0x5   :  { %916 = vmatmul.mubr.msk.bf16.vlgmr.msra.gmra.mrb[0].mxu0 %vm41_vm1, %v32_v2  ;;  %v1036_v5 = vld [vmem:[%s1371_s5] sm:$0xff]   ;;  %v1042_v18 = vld [vmem:[%s1372_s6 + $0x28] sm:$0xff]  }
   0x6   :  { %920 = vmatpush3.bf16.msra.mxu0 %v1035_v3  ;;  %921 = vmatprep.mubr.msk.bf16.mxu0 %vm1104_vm0, %v1103_v1  ;;  %v1045_v6 = vld [vmem:[%s1372_s6 + $0x40] sm:$0xff]  }
   0x7   :  { %925 = vmatprep.subr.bf16.mxu0 %v1103_v1  ;;  %932 = vmatpush3.bf16.msra.mxu1 %v1045_v6  ;;  %v1037_v8 = vld [vmem:[%s1372_s6] sm:$0xff]  }
   0x8   :  { %933 = vmatprep.subr.bf16.mxu1 %v1103_v1  ;;  %v1053_v13 = vld [vmem:[%s1372_s6 + $0x60] sm:$0xff]  }
   0x9   :  { %v1041_v16 = vld [vmem:[%s1372_s6 + $0x20] sm:$0xff]  }
   0xb   :  { %934 = vmatpush3.bf16.msra.mxu1 %v1047_v7 }
   0xc   :  { %935 = vmatprep.subr.bf16.mxu1 %v1103_v1 }
   0xd   :  { %922 = vmatmul.mubr.msk.bf16.vlgmr.msra.gmra.mrb[4].mxu0 %vm41_vm1, %v85_v4 }
   0xe   :  { %926 = vmatpush3.bf16.msra.mxu0 %v1036_v5  ;;  %927 = vmatprep.mubr.msk.bf16.mxu0 %vm1104_vm0, %v1103_v1 }
   0xf   :  { %951 = vmatprep.subr.bf16.mxu0 %v1103_v1  ;;  %936 = vmatpush3.bf16.msra.mxu1 %v1049_v9 }
  0x10   :  { %937 = vmatprep.subr.bf16.mxu1 %v1103_v1 }
  0x13   :  { %938 = vmatpush3.bf16.msra.mxu1 %v1051_v11 }
  0x14   :  { %939 = vmatprep.subr.bf16.mxu1 %v1103_v1 }
  0x15   :  { %928 = vmatmul.mubr.msk.bf16.vlgmr.msra.gmra.mrb[8].mxu0 %vm41_vm1, %v32_v2 }
  0x16   :  { %952 = vmatpush3.bf16.msra.mxu0 %v1037_v8  ;;  %967 = vmatprep.mubr.msk.bf16.mxu0 %vm1104_vm0, %v1103_v1 }
  0x17   :  { %953 = vmatprep.subr.bf16.mxu0 %v1103_v1  ;;  %940 = vmatpush3.bf16.msra.mxu1 %v1053_v13 }
  0x18   :  { %941 = vmatprep.subr.bf16.mxu1 %v1103_v1 }
  0x1a   :  { %954 = vmatpush3.bf16.msra.mxu0 %v1038_v10 }
  0x1b   :  { %955 = vmatprep.subr.bf16.mxu0 %v1103_v1  ;;  %942 = vmatpush3.bf16.msra.mxu1 %v1055_v15 }
  0x1c   :  { %943 = vmatprep.subr.bf16.mxu1 %v1103_v1 }
  0x1e   :  { %956 = vmatpush3.bf16.msra.mxu0 %v1039_v12 }
  0x1f   :  { %957 = vmatprep.subr.bf16.mxu0 %v1103_v1 }
  0x22   :  { %958 = vmatpush3.bf16.msra.mxu0 %v1040_v14 }
  0x23   :  { %959 = vmatprep.subr.bf16.mxu0 %v1103_v1 }
  0x26   :  { %960 = vmatpush3.bf16.msra.mxu0 %v1041_v16 }
  0x27   :  { %13 = vsyncpa [#allocation3], 0  ;;  %961 = vmatprep.subr.bf16.mxu0 %v1103_v1  ;;  %944 = vmatpush3.bf16.msra.mxu1 %v1057_v17  ;;  %v1059_v19 = vld [vmem:[%s1372_s6 + $0x78] sm:$0xff]   ;;  %v1043_v20 = vld [vmem:[%s1372_s6 + $0x30] sm:$0xff]   ;;  %s1105_s4 = smov [#allocation2]  }
  0x28   :  { %945 = vmatprep.subr.bf16.mxu1 %v1103_v1  ;;  %v1044_v21 = vld [vmem:[%s1372_s6 + $0x38] sm:$0xff]   ;;  %v31_v22 = vld [vmem:[%s1366_s0] sm:$0xf]  ;;  %v1048_v24 = vld [vmem:[%s1372_s6 + $0xc8] sm:$0xff]   ;;  %s743_s13 = sshll.u32 %s1105_s4, 4  ;;  %s744_s13 = int_to_ptr.vmem [resolvable:$true] %s743_s13 }
  0x29   :  { %v1046_v23 = vld [vmem:[%s1372_s6 + $0xc0] sm:$0xff]   ;;  %v1050_v25 = vld [vmem:[%s1372_s6 + $0xd0] sm:$0xff]   ;;  %v1052_v26 = vld [vmem:[%s1372_s6 + $0xd8] sm:$0xff]   ;;  %v185_v31 = vunpack.c.l.bf16 %v31_v22  ;;  %p1084_p1 = scmp.lt.s32.totalorder %s744_s13, %s744_s13 }
  0x2a   :  { %962 = vmatpush3.bf16.msra.mxu0 %v1042_v18  ;;  %v1054_v27 = vld [vmem:[%s1372_s6 + $0xe0] sm:$0xff]   ;;  %v1056_v28 = vld [vmem:[%s1372_s6 + $0xe8] sm:$0xff]   ;;  %v1058_v29 = vld [vmem:[%s1372_s6 + $0xf0] sm:$0xff]  }
  0x2b   :  { %963 = vmatprep.subr.bf16.mxu0 %v1103_v1  ;;  %946 = vmatpush3.bf16.msra.mxu1 %v1059_v19  ;;  %v1060_v30 = vld [vmem:[%s1372_s6 + $0xf8] sm:$0xff]   ;;  %v1061_v33 = vld [vmem:[%s1372_s6 + $0x80] sm:$0xff]   ;;  %v1062_v40 = vld [vmem:[%s1372_s6 + $0x88] sm:$0xff]  }
  0x2c   :  { %971 = vmatprep.subr.bf16.mxu1 %v1103_v1  ;;  %v1063_v41 = vld [vmem:[%s1372_s6 + $0x90] sm:$0xff]   ;;  %v1064_v47 = vld [vmem:[%s1372_s6 + $0x98] sm:$0xff]   ;;  %v1065_v48 = vld [vmem:[%s1372_s6 + $0xa0] sm:$0xff]  }
  0x2d   :  { %v1066_v53 = vld [vmem:[%s1372_s6 + $0xa8] sm:$0xff]   ;;  %v1067_v54 = vld [vmem:[%s1372_s6 + $0xb0] sm:$0xff]   ;;  %v1068_v55 = vld [vmem:[%s1372_s6 + $0xb8] sm:$0xff]  }
  0x2e   :  { %964 = vmatpush3.bf16.msra.mxu0 %v1043_v20  ;;  %v1069_v57 = vld [vmem:[%s1372_s6 + $0x100] sm:$0xff]   ;;  %v1070_v58 = vld [vmem:[%s1372_s6 + $0x108] sm:$0xff]   ;;  %v1071_v59 = vld [vmem:[%s1372_s6 + $0x110] sm:$0xff]  }
  0x2f   :  { %965 = vmatprep.subr.bf16.mxu0 %v1103_v1  ;;  %v1072_v60 = vld [vmem:[%s1372_s6 + $0x118] sm:$0xff]   ;;  %v1073_v61 = vld [vmem:[%s1372_s6 + $0x120] sm:$0xff]   ;;  %v1074_v3 = vld [vmem:[%s1372_s6 + $0x128] sm:$0xff]  }
  0x30   :  { %v1075_v4 = vld [vmem:[%s1372_s6 + $0x130] sm:$0xff]   ;;  %v1076_v5 = vld [vmem:[%s1372_s6 + $0x138] sm:$0xff]  }
  0x32   :  { %966 = vmatpush3.bf16.msra.mxu0 %v1044_v21 }
  0x33   :  { %991 = vmatprep.subr.bf16.mxu0 %v1103_v1 }
  0x35   :  { %968 = vmatmul.mubr.bf16.vlgmr.msra.gmra.mrb[12].mxu0 %v31_v22 }
  0x36   :  { %992 = vmatpush3.bf16.msra.mxu0 %v1046_v23  ;;  %1007 = vmatprep.mubr.msk.bf16.mxu0 %vm1104_vm0, %v1103_v1 }
  0x37   :  { %993 = vmatprep.subr.bf16.mxu0 %v1103_v1 }
  0x3a   :  { %994 = vmatpush3.bf16.msra.mxu0 %v1048_v24 }
  0x3b   :  { %995 = vmatprep.subr.bf16.mxu0 %v1103_v1 }
  0x3e   :  { %996 = vmatpush3.bf16.msra.mxu0 %v1050_v25 }
  0x3f   :  { %997 = vmatprep.subr.bf16.mxu0 %v1103_v1 }
  0x42   :  { %998 = vmatpush3.bf16.msra.mxu0 %v1052_v26 }
  0x43   :  { %999 = vmatprep.subr.bf16.mxu0 %v1103_v1 }
  0x46   :  { %1000 = vmatpush3.bf16.msra.mxu0 %v1054_v27 }
  0x47   :  { %1001 = vmatprep.subr.bf16.mxu0 %v1103_v1 }
  0x4a   :  { %1002 = vmatpush3.bf16.msra.mxu0 %v1056_v28 }
  0x4b   :  { %1003 = vmatprep.subr.bf16.mxu0 %v1103_v1 }
  0x4e   :  { %1004 = vmatpush3.bf16.msra.mxu0 %v1058_v29 }
  0x4f   :  { %1005 = vmatprep.subr.bf16.mxu0 %v1103_v1 }
  0x52   :  { %1006 = vmatpush3.bf16.msra.mxu0 %v1060_v30 }
  0xd8   :  { %v79_v32 = vpop.f32.mrb[0].mxu0 }
  0xd9   :  { %v187_v34 = vmul.f32 %v185_v31, %v79_v32  ;;  %v204_v35 = vpack.c.bf16 %v79_v32, %v79_v32  ;;  %v917_v36 = vpop.f32.mrb[1].mxu0 }
  0xda   :  { %v82_v37 = vpop.f32.mrb[2].mxu0 }
  0xdb   :  { %v505_v38 = vpack.c.bf16 %v187_v34, %v187_v34  ;;  %v918_v39 = vpop.f32.mrb[3].mxu0  ;;  %948 = vmatmul.mubr.bf16.vlgmr.msra.gmra.mrb[0].mxu1 %v204_v35 }
  0xdc   :  { %972 = vmatpush3.bf16.msra.mxu1 %v1061_v33  ;;  %987 = vmatprep.mubr.msk.bf16.mxu1 %vm1104_vm0, %v1103_v1 }
  0xdd   :  { %1008 = vmatmul.mubr.bf16.vlgmr.msra.gmra.mrb[16].mxu0 %v505_v38  ;;  %973 = vmatprep.subr.bf16.mxu1 %v1103_v1 }
  0xe0   :  { %974 = vmatpush3.bf16.msra.mxu1 %v1062_v40  ;;  %v131_v42 = vpop.f32.mrb[4].mxu0 }
  0xe1   :  { %975 = vmatprep.subr.bf16.mxu1 %v1103_v1  ;;  %v186_v43 = vmul.f32 %v185_v31, %v131_v42  ;;  %v923_v44 = vpop.f32.mrb[5].mxu0 }
  0xe2   :  { %v134_v45 = vpop.f32.mrb[6].mxu0 }
  0xe3   :  { %v924_v46 = vpop.f32.mrb[7].mxu0  ;;  %v398_v56 = vpack.c.bf16 %v186_v43, %v186_v43 }
  0xe4   :  { %976 = vmatpush3.bf16.msra.mxu1 %v1063_v41 }
  0xe5   :  { %977 = vmatprep.subr.bf16.mxu1 %v1103_v1 }
  0xe8   :  { %978 = vmatpush3.bf16.msra.mxu1 %v1064_v47  ;;  %v179_v49 = vpop.f32.mrb[8].mxu0 }
  0xe9   :  { %979 = vmatprep.subr.bf16.mxu1 %v1103_v1  ;;  %v929_v50 = vpop.f32.mrb[9].mxu0  ;;  %v612_v6 = vpack.c.bf16 %v179_v49, %v179_v49 }
  0xea   :  { %v182_v51 = vpop.f32.mrb[10].mxu0 }
  0xeb   :  { %v930_v52 = vpop.f32.mrb[11].mxu0 }
  0xec   :  { %980 = vmatpush3.bf16.msra.mxu1 %v1065_v48 }
  0xed   :  { %981 = vmatprep.subr.bf16.mxu1 %v1103_v1 }
  0xf0   :  { %982 = vmatpush3.bf16.msra.mxu1 %v1066_v53 }
  0xf1   :  { %983 = vmatprep.subr.bf16.mxu1 %v1103_v1 }
  0xf4   :  { %984 = vmatpush3.bf16.msra.mxu1 %v1067_v54 }
  0xf5   :  { %985 = vmatprep.subr.bf16.mxu1 %v1103_v1 }
  0xf8   :  { %986 = vmatpush3.bf16.msra.mxu1 %v1068_v55 }
  0xf9   :  { %1011 = vmatprep.subr.bf16.mxu1 %v1103_v1 }
  0xfb   :  { %988 = vmatmul.mubr.bf16.vlgmr.msra.gmra.mrb[4].mxu1 %v398_v56 }
  0xfc   :  { %1012 = vmatpush3.bf16.msra.mxu1 %v1069_v57  ;;  %1027 = vmatprep.mubr.msk.bf16.mxu1 %vm1104_vm0, %v1103_v1 }
  0xfd   :  { %1013 = vmatprep.subr.bf16.mxu1 %v1103_v1 }
 0x100   :  { %1014 = vmatpush3.bf16.msra.mxu1 %v1070_v58 }
 0x101   :  { %1015 = vmatprep.subr.bf16.mxu1 %v1103_v1 }
 0x104   :  { %1016 = vmatpush3.bf16.msra.mxu1 %v1071_v59 }
 0x105   :  { %1017 = vmatprep.subr.bf16.mxu1 %v1103_v1 }
 0x108   :  { %1018 = vmatpush3.bf16.msra.mxu1 %v1072_v60  ;;  %v392_v62 = vpop.f32.mrb[12].mxu0 }
 0x109   :  { %1019 = vmatprep.subr.bf16.mxu1 %v1103_v1  ;;  %v969_v63 = vpop.f32.mrb[13].mxu0 }
 0x10a   :  { %v395_v0 = vpop.f32.mrb[14].mxu0 }
 0x10b   :  { %v970_v2 = vpop.f32.mrb[15].mxu0 }
 0x10c   :  { %1020 = vmatpush3.bf16.msra.mxu1 %v1073_v61 }
 0x10d   :  { %1021 = vmatprep.subr.bf16.mxu1 %v1103_v1 }
 0x110   :  { %1022 = vmatpush3.bf16.msra.mxu1 %v1074_v3 }
 0x111   :  { %1023 = vmatprep.subr.bf16.mxu1 %v1103_v1 }
 0x114   :  { %1024 = vmatpush3.bf16.msra.mxu1 %v1075_v4 }
 0x115   :  { %1025 = vmatprep.subr.bf16.mxu1 %v1103_v1  ;;  %v861_v1 = vld [vmem:[%s1373_s7] ss:$0 sm:$0xff]  ;;  %s1079_s7 = scalar_lea.vmem %s744_s13, 128 }
 0x116   :  { %p1080_p0 = scmp.ne.s32.totalorder %s744_s13, %s1079_s7  ;;  %p1085_p2 = scmp.lt.s32.totalorder %s1079_s7, %s1079_s7 }
 0x118   :  { %1026 = vmatpush3.bf16.msra.mxu1 %v1076_v5  ;;  %p1086_p3 = por %p1085_p2, %p1084_p1 }
 0x11a   :  { %p1087_p4 = pnand %p1086_p3, %p1080_p0 }
 0x11b   :  { %1028 = vmatmul.mubr.bf16.vlgmr.msra.gmra.mrb[8].mxu1 %v612_v6 }
 0x1ae   :  { %v304_v7 = vpop.f32.mrb[0].mxu1 }
 0x1af   :  { %v393_v8 = vadd.f32 %v392_v62, %v304_v7  ;;  %v949_v9 = vpop.f32.mrb[1].mxu1 }
 0x1b0   :  { %v307_v10 = vpop.f32.mrb[2].mxu1  ;;  %v605_v11 = vpop.f32.mrb[16].mxu0 }
 0x1b1   :  { %v950_v12 = vpop.f32.mrb[3].mxu1  ;;  %v1009_v13 = vpop.f32.mrb[17].mxu0 }
 0x1b2   :  { %v608_v14 = vpop.f32.mrb[18].mxu0 }
 0x1b3   :  { %v1010_v15 = vpop.f32.mrb[19].mxu0 }
 0x1ce   :  { %v498_v16 = vpop.f32.mrb[4].mxu1 }
 0x1cf   :  { %v504_v17 = vadd.f32 %v498_v16, %v393_v8  ;;  %v989_v18 = vpop.f32.mrb[5].mxu1 }
 0x1d0   :  { %v501_v19 = vpop.f32.mrb[6].mxu1 }
 0x1d1   :  { %v990_v20 = vpop.f32.mrb[7].mxu1  ;;  %v611_v21 = vadd.f32 %v605_v11, %v504_v17 }
 0x1ee   :  { %v712_v22 = vpop.f32.mrb[8].mxu1 }
 0x1ef   :  { %v718_v23 = vadd.f32 %v712_v22, %v611_v21  ;;  %v1029_v24 = vpop.f32.mrb[9].mxu1 }
 0x1f0   :  { %v715_v25 = vpop.f32.mrb[10].mxu1 }
 0x1f1   :  { %v726_v26 = vadd.f32 %v861_v1, %v718_v23  ;;  %v1030_v27 = vpop.f32.mrb[11].mxu1 }
 0x1f3   :  { %vm727_vm2 = vcmp.ge.f32.partialorder %v726_v26, 0.0  ;;  %v728_v28 = vmul.f32 0.01, %v726_v26 }
 0x1f5   :  { %v729_v29 = vsel %vm727_vm2, %v726_v26, %v728_v28 }
 0x1f6   :  { %v730_v30 = vmul.f32 %v729_v29, %v729_v29 }
 0x1f8   :  { %731 = vadd.xlane.f32.xlu0 %v730_v30 }
 0x285   :  { %v732_v31 = vpop.xlane.xlu0 %731 }
 0x286   :  { %v733_v32 = vmax.f32 %v732_v31, 1e-24 }
 0x288   :  { %1077 = vrsqrt.f32 %v733_v32 }
 0x292   :  { %v1078_v33 = vpop.eup %1077 }
 0x293   :  { %v735_v34 = vmul.f32 %v1078_v33, %v729_v29 }
 0x295   :  { %736 = vst [vmem:[#allocation2] sm:$0xff] %v735_v34 }
 0x296   :  { %1090 = shalt.err (!%p1087_p4)
}
 0x297   :  { %s1091_s3 = scalar_lea.hbm %s1374_s8, 128 }
 0x298   :  { %p1092_p5 = scmp.ne.s32.totalorder %s1374_s8, %s1091_s3  ;;  %p1095_p6 = scmp.lt.u32.totalorder %s1091_s3, %s1374_s8 }
 0x29a   :  { %p1097_p7 = pnand %p1095_p6, %p1092_p5 }
 0x29c   :  { %1100 = shalt.err (!%p1097_p7)
}
 0x29d   :  { %746 = dma.vmem_to_hbm [thread:$0]  %s744_s13, 128, %s1374_s8, [#allocation3]  }
 0x29e   :  { %1101 = dma.done.wait [#allocation3], 128  }
 0x29f   :  { %1102 = vsyncadd [#allocation3], 4294967168 }
 0x2a0   :  { %750 = vsyncpa [#allocation3], 1 }

</bundles_post_ra>
